<compile_context>
chip_gen: v7x
topology: tpu7x:2x2x1
jax: 0.10.0
libtpu: 0.0.40
codegen_flags: <defaults>
</compile_context>

<pallas_src>
import jax
import jax.numpy as jnp
from jax.experimental import pallas as pl
from jax.experimental.pallas import tpu as pltpu

T_CHUNK = 8                           # timesteps per recurrent grid step
_VMEM_LIMIT = 48 * 1024 * 1024        # < 64 MiB physical on v7x; ample on v5e/v6e


def _round_up(x, m):
    return (x + m - 1) // m * m


def _pick_tile(total, cap):
    """Largest multiple of 128 that divides `total` (a multiple of 128) and is
    <= cap.  Keeps output tiles lane-dense while letting the streamed weight
    tile grow (tile sweeps: 128-wide ~29% of HBM roofline, 512+ ~85%)."""
    cap = max(128, min(cap, total))
    best = 128
    d = 128
    while d <= cap:
        if total % d == 0:
            best = d
        d += 128
    return best


# ------------- hoisted input projection: gates_x = X @ W_ih^T + b ------------
def _proj_kernel(x_ref, w_ref, b_ref, o_ref):
    w = w_ref[...]
    o_ref[...] = (jnp.dot(x_ref[...].astype(w.dtype), w,
                          preferred_element_type=jnp.float32)
                  + b_ref[...])


def input_projection(x2d, w_ih_t, bias, *, tn_cap=2048):
    """x2d: (M, Din) f32; w_ih_t: (Din, 4H) bf16/f32; bias: (1, 4H) f32."""
    M, Din = x2d.shape
    G = w_ih_t.shape[1]                                   # 4*H_pad
    assert M % 8 == 0 and Din % 128 == 0 and G % 128 == 0
    tn = _pick_tile(G, tn_cap)
    return pl.pallas_call(
        _proj_kernel,
        out_shape=jax.ShapeDtypeStruct((M, G), jnp.float32),
        grid_spec=pltpu.PrefetchScalarGridSpec(
            num_scalar_prefetch=0,
            grid=(G // tn,),
            in_specs=[
                # x is read by every gate tile -> whole array, single VMEM copy
                pl.BlockSpec(memory_space=pltpu.MemorySpace.VMEM),
                pl.BlockSpec((Din, tn), lambda j: (0, j)),   # streamed weight
                pl.BlockSpec((1, tn), lambda j: (0, j)),
            ],
            out_specs=pl.BlockSpec((M, tn), lambda j: (0, j)),
        ),
        compiler_params=pltpu.CompilerParams(
            dimension_semantics=("parallel",),
            vmem_limit_bytes=_VMEM_LIMIT),
    )(x2d, w_ih_t, bias)


# ----------------------------- LSTM recurrence -------------------------------
def _lstm_recurrent_kernel(gx_ref, w_hh_ref, out_ref, h_scr, c_scr):
    @pl.when(pl.program_id(0) == 0)
    def _():
        h_scr[...] = jnp.zeros_like(h_scr)
        c_scr[...] = jnp.zeros_like(c_scr)

    H = h_scr.shape[1]
    T = gx_ref.shape[0]
    wdt = w_hh_ref.dtype

    def step(t, carry):
        # One gate at a time (PyTorch order i, f, g, o): only ~2 activated
        # gates + c + h live at once -> no vreg spills even at H ~ 1152.
        h = h_scr[...].astype(wdt)

        def gate(k):
            return (gx_ref[t, :, k * H:(k + 1) * H]
                    + jnp.dot(h, w_hh_ref[:, k * H:(k + 1) * H],
                              preferred_element_type=jnp.float32))

        i = jax.nn.sigmoid(gate(0))
        g = jnp.tanh(gate(2))
        ig = i * g                              # i, g dead after this
        f = jax.nn.sigmoid(gate(1))
        c_new = f * c_scr[...] + ig             # f dead
        o = jax.nn.sigmoid(gate(3))
        h_new = o * jnp.tanh(c_new)
        c_scr[...] = c_new
        h_scr[...] = h_new
        out_ref[t] = h_new
        return carry

    jax.lax.fori_loop(0, T, step, 0, unroll=True)


def lstm_layer(x, w_ih_t, w_hh_t, bias, *, t_chunk=T_CHUNK):
    """x: (S, B_pad, Din_pad) f32 with S % t_chunk == 0, B_pad % 8 == 0.
    Weights pre-transposed/padded: w_ih_t (Din_pad, 4H_pad),
    w_hh_t (H_pad, 4H_pad), bias (1, 4H_pad) = b_ih + b_hh."""
    S, Bp, Din = x.shape
    H = w_hh_t.shape[0]
    assert S % t_chunk == 0 and Bp % 8 == 0 and H % 128 == 0

    # Stage 1: one big batched matmul for all timesteps (full MXU occupancy).
    gx = input_projection(x.reshape(S * Bp, Din), w_ih_t, bias)
    gx = gx.reshape(S, Bp, 4 * H)

    # Stage 2: serial recurrence over fixed-size time chunks.
    return pl.pallas_call(
        _lstm_recurrent_kernel,
        out_shape=jax.ShapeDtypeStruct((S, Bp, H), jnp.float32),
        grid_spec=pltpu.PrefetchScalarGridSpec(
            num_scalar_prefetch=0,
            grid=(S // t_chunk,),
            in_specs=[
                pl.BlockSpec((t_chunk, Bp, 4 * H), lambda c: (c, 0, 0)),
                # constant weight: whole array, ONE VMEM buffer (no double
                # buffering) -- key for v7x's 64 MiB VMEM at H ~ 1152
                pl.BlockSpec(memory_space=pltpu.MemorySpace.VMEM),
            ],
            out_specs=pl.BlockSpec((t_chunk, Bp, H), lambda c: (c, 0, 0)),
            scratch_shapes=[
                pltpu.VMEM((Bp, H), jnp.float32),   # h state (carried, f32)
                pltpu.VMEM((Bp, H), jnp.float32),   # c state (carried, f32)
            ],
        ),
        compiler_params=pltpu.CompilerParams(
            dimension_semantics=("arbitrary",),     # recurrent -> sequential
            vmem_limit_bytes=_VMEM_LIMIT),
    )(gx, w_hh_t)


# ------------------------------ decoder kernel -------------------------------
def _decoder_kernel(x_ref, w_ref, o_ref):
    w = w_ref[...]
    o_ref[...] = jnp.dot(x_ref[...].astype(w.dtype), w,
                         preferred_element_type=jnp.float32)


def decoder_matmul(x, w_dec_t, *, tv_cap=2048):
    """x: (S, E_pad) f32; w_dec_t: (E_pad, V_pad) pre-transposed, bias-free."""
    S, E = x.shape
    Vp = w_dec_t.shape[1]
    assert E % 128 == 0 and Vp % 128 == 0
    S_pad = _round_up(S, 8)
    if S_pad != S:
        x = jnp.pad(x, ((0, S_pad - S), (0, 0)))
    tv = _pick_tile(Vp, tv_cap)                    # big weight-streaming tiles
    out = pl.pallas_call(
        _decoder_kernel,
        out_shape=jax.ShapeDtypeStruct((S_pad, Vp), jnp.float32),
        grid_spec=pltpu.PrefetchScalarGridSpec(
            num_scalar_prefetch=0,
            grid=(Vp // tv,),
            in_specs=[
                pl.BlockSpec(memory_space=pltpu.MemorySpace.VMEM),  # small, resident
                pl.BlockSpec((E, tv), lambda j: (0, j)),
            ],
            out_specs=pl.BlockSpec((S_pad, tv), lambda j: (0, j)),
        ),
        compiler_params=pltpu.CompilerParams(
            dimension_semantics=("parallel",),      # vocab tiles independent
            vmem_limit_bytes=_VMEM_LIMIT),
    )(x, w_dec_t)
    return out[:S]


# --------------------------- parameter preparation ---------------------------
def prepare_params(params, param_dtype=jnp.bfloat16):
    """One-time layout conversion: transpose weights, fold biases, pad H/E to
    multiples of 128 and vocab to a multiple of 512, cast weights to
    `param_dtype` (bf16 by default; activations/bias/states stay f32)."""
    emb = params["embedding"].astype(jnp.float32)
    V, E = emb.shape
    E_pad = _round_up(E, 128)
    kp = {
        "embedding": jnp.pad(emb, ((0, 0), (0, E_pad - E))),
        "vocab": V,
        "rnns": [],
    }
    in_dim, in_pad = E, E_pad
    for (w_ih, w_hh, b_ih, b_hh) in params["rnns"]:
        H = w_hh.shape[1]
        H_pad = _round_up(H, 128)
        # Pad each gate block separately (PyTorch layout: 4 stacked H-blocks).
        w_ih4 = jnp.pad(w_ih.reshape(4, H, in_dim),
                        ((0, 0), (0, H_pad - H), (0, in_pad - in_dim)))
        w_hh4 = jnp.pad(w_hh.reshape(4, H, H),
                        ((0, 0), (0, H_pad - H), (0, H_pad - H)))
        b4 = jnp.pad((b_ih + b_hh).reshape(4, H), ((0, 0), (0, H_pad - H)))
        kp["rnns"].append((
            jnp.transpose(w_ih4.reshape(4 * H_pad, in_pad)).astype(param_dtype),
            jnp.transpose(w_hh4.reshape(4 * H_pad, H_pad)).astype(param_dtype),
            b4.reshape(1, 4 * H_pad).astype(jnp.float32),
        ))
        in_dim, in_pad = H, H_pad

    dec = params["decoder"]
    V_dec, E_dec = dec.shape
    assert V_dec == V and E_dec == in_dim
    V_pad = _round_up(V, 512)
    dec_p = jnp.pad(dec, ((0, V_pad - V), (0, in_pad - E_dec)))
    kp["decoder_t"] = jnp.transpose(dec_p).astype(param_dtype)     # (E_pad, V_pad)
    return kp


# ------------------------------ full forward ---------------------------------
def lang_model_forward(tokens, kparams):
    S, B = tokens.shape
    # embedding lookup (gather) is glue -> plain JAX
    emb = jnp.take(kparams["embedding"], tokens, axis=0)           # (S, B, E_pad)
    B_pad = _round_up(B, 8)             # full sublane group
    S_pad = _round_up(S, T_CHUNK)       # whole time chunks; no full-seq unroll
    out = jnp.pad(emb, ((0, S_pad - S), (0, B_pad - B), (0, 0)))
    for (w_ih_t, w_hh_t, bias) in kparams["rnns"]:
        out = lstm_layer(out, w_ih_t, w_hh_t, bias)
    # `out[:, -1]` in the spec = LAST BATCH element (time-major), i.e. real
    # batch index B-1 across all timesteps -> (S, H_last_pad).
    last = out[:S, B - 1]
    logits = decoder_matmul(last, kparams["decoder_t"])            # (S, V_pad)
    return logits[:, :kparams["vocab"]]


# ------------------------------ pure-JAX reference ----------------------------
def _lstm_ref(x, w_ih, w_hh, b_ih, b_hh):
    H = w_hh.shape[1]
    hi = jax.lax.Precision.HIGHEST

    def step(carry, x_t):
        h, c = carry
        gates = (jnp.dot(x_t, w_ih.T, precision=hi)
                 + jnp.dot(h, w_hh.T, precision=hi) + b_ih + b_hh)
        i, f, g, o = jnp.split(gates, 4, axis=-1)
        c_new = jax.nn.sigmoid(f) * c + jax.nn.sigmoid(i) * jnp.tanh(g)
        h_new = jax.nn.sigmoid(o) * jnp.tanh(c_new)
        return (h_new, c_new), h_new

    B = x.shape[1]
    init = (jnp.zeros((B, H), jnp.float32), jnp.zeros((B, H), jnp.float32))
    _, ys = jax.lax.scan(step, init, x)
    return ys


def lang_model_ref(tokens, params):
    out = jnp.take(params["embedding"], tokens, axis=0)
    for (w_ih, w_hh, b_ih, b_hh) in params["rnns"]:
        out = _lstm_ref(out, w_ih, w_hh, b_ih, b_hh)
    return jnp.dot(out[:, -1], params["decoder"].T,
                   precision=jax.lax.Precision.HIGHEST)


# ---------------------------------- main --------------------------------------
if __name__ == "__main__":
    # Scaled-down sizes (original: emb=400, hidden=1150,1150,400, vocab=len(itos)).
    # Deliberately NOT multiples of 128 so the padding path is exercised.
    VOCAB, EMB = 1000, 96
    HIDDENS = [160, 192, EMB]          # last LSTM projects back to embedding size
    SEQ, BATCH = 10, 2

    key = jax.random.PRNGKey(0)

    def uni(k, shape, scale=0.1):
        return jax.random.uniform(k, shape, jnp.float32, -scale, scale)

    keys = jax.random.split(key, 16)
    params = {
        "embedding": uni(keys[0], (VOCAB, EMB)),
        "decoder": uni(keys[1], (VOCAB, EMB)),
        "rnns": [],
    }
    in_dim = EMB
    ki = 2
    for H in HIDDENS:
        w_ih = uni(keys[ki], (4 * H, in_dim)); ki += 1
        w_hh = uni(keys[ki], (4 * H, H)); ki += 1
        b_ih = uni(keys[ki], (4 * H,)); ki += 1
        b_hh = uni(keys[ki], (4 * H,)); ki += 1
        params["rnns"].append((w_ih, w_hh, b_ih, b_hh))
        in_dim = H

    tokens = jax.random.randint(keys[ki], (SEQ, BATCH), 0, VOCAB, jnp.int32)

    ref = jax.block_until_ready(lang_model_ref(tokens, params))

    # --- f32-weight path: tight correctness check against HIGHEST-precision ref
    kp_f32 = prepare_params(params, param_dtype=jnp.float32)
    out_f32 = jax.block_until_ready(lang_model_forward(tokens, kp_f32))
    assert out_f32.shape == (SEQ, VOCAB), out_f32.shape
    assert jnp.allclose(out_f32, ref, rtol=2e-4, atol=2e-4), (
        float(jnp.max(jnp.abs(out_f32 - ref))))

    # --- bf16-weight path (production default): halves weight streaming; f32
    #     accumulation + f32 h/c keep it close to the f32 reference.
    kp_bf16 = prepare_params(params)   # param_dtype=bf16
    out_bf16 = jax.block_until_ready(lang_model_forward(tokens, kp_bf16))
    assert out_bf16.shape == (SEQ, VOCAB), out_bf16.shape
    assert float(jnp.max(jnp.abs(out_bf16 - ref))) < 2e-2, (
        float(jnp.max(jnp.abs(out_bf16 - ref))))

    print("KERNEL_OK")
</pallas_src>

<mosaic_0001>
module attributes {stable_mosaic.version = 11 : i64} {
  func.func @_proj_kernel(%arg0: i32, %arg1: memref<128x128xf32, #tpu.memory_space<vmem>>, %arg2: memref<128x1024xf32, #tpu.memory_space<vmem>>, %arg3: memref<1x1024xf32, #tpu.memory_space<vmem>>, %arg4: memref<128x1024xf32, #tpu.memory_space<vmem>>) attributes {dimension_semantics = [#tpu.dimension_semantics<parallel>], iteration_bounds = array<i64: 1>, scalar_prefetch = 0 : i64, scratch_operands = 0 : i64, tpu.core_type = #tpu.core_type<tc>, window_params = [{pipeline_mode = #tpu.pipeline_mode<synchronous>, transform_indices = @transform_0, window_bounds = array<i64: 128, 128>}, {transform_indices = @transform_1, window_bounds = array<i64: 128, 1024>}, {transform_indices = @transform_2, window_bounds = array<i64: 1, 1024>}, {transform_indices = @transform_3, window_bounds = array<i64: 128, 1024>}]} {
    %c0 = arith.constant 0 : index
    %c0_0 = arith.constant 0 : index
    %0 = vector.load %arg2[%c0, %c0_0] : memref<128x1024xf32, #tpu.memory_space<vmem>>, vector<128x1024xf32>
    %c0_1 = arith.constant 0 : index
    %c0_2 = arith.constant 0 : index
    %1 = vector.load %arg1[%c0_1, %c0_2] : memref<128x128xf32, #tpu.memory_space<vmem>>, vector<128x128xf32>
    %cst = arith.constant dense<0.000000e+00> : vector<128x1024xf32>
    %2 = tpu.matmul %1, %0, %cst {dimension_numbers = #tpu.dot_dimension_numbers<[1], [0], [0], [1], [0, 0, 1, 1], [], []>} : vector<128x128xf32>, vector<128x1024xf32>, vector<128x1024xf32> -> vector<128x1024xf32>
    %c0_3 = arith.constant 0 : index
    %c0_4 = arith.constant 0 : index
    %3 = vector.load %arg3[%c0_3, %c0_4] : memref<1x1024xf32, #tpu.memory_space<vmem>>, vector<1x1024xf32>
    %4 = vector.broadcast %3 : vector<1x1024xf32> to vector<128x1024xf32>
    %5 = arith.addf %2, %4 : vector<128x1024xf32>
    %c0_5 = arith.constant 0 : index
    %c0_6 = arith.constant 0 : index
    %6 = vector.load %arg4[%c0_5, %c0_6] : memref<128x1024xf32, #tpu.memory_space<vmem>>, vector<128x1024xf32>
    tpu.vector_store %arg4[%c0_5, %c0_6], %5 {strides = array<i32>} : memref<128x1024xf32, #tpu.memory_space<vmem>>, vector<128x1024xf32>,
    return
  }
  func.func @transform_0(%arg0: i32) -> (i32, i32) {
    %c0_i32 = arith.constant 0 : i32
    %c0_i32_0 = arith.constant 0 : i32
    %c0_i32_1 = arith.constant 0 : i32
    return %c0_i32, %c0_i32_0 : i32, i32
  }
  func.func @transform_1(%arg0: i32) -> (i32, i32) {
    %c0_i32 = arith.constant 0 : i32
    %c0_i32_0 = arith.constant 0 : i32
    return %c0_i32, %arg0 : i32, i32
  }
  func.func @transform_2(%arg0: i32) -> (i32, i32) {
    %c0_i32 = arith.constant 0 : i32
    %c0_i32_0 = arith.constant 0 : i32
    return %c0_i32, %arg0 : i32, i32
  }
  func.func @transform_3(%arg0: i32) -> (i32, i32) {
    %c0_i32 = arith.constant 0 : i32
    %c0_i32_0 = arith.constant 0 : i32
    return %c0_i32, %arg0 : i32, i32
  }
}

</mosaic_0001>

<bundles_post_ra>
// kernel: tpu_custom_call.1
= control target key start
LH: loop header
LB: loop body
LE: loop exit
PB: predicated region body
PF: predicated region fallthrough
CT: control target
= control target key end

     0   :  { %8 = vsyncpa [#allocation3], 0  ;;  %s1668_s0 = inlined_call_operand.hbm [shape: f32[128,128], index: 0, kind: input, shape index: {}]   ;;  %s1669_s1 = inlined_call_operand.hbm [shape: f32[128,1024], index: 1, kind: input, shape index: {}]   ;;  %s1670_s2 = inlined_call_operand.hbm [shape: f32[1,1024], index: 2, kind: input, shape index: {}]   ;;  %s1671_s3 = inlined_call_operand.hbm [shape: f32[128,1024], index: 3, kind: output, shape index: {}]  }
   0x1   :  { %9 = vsyncpa [#allocation6], 0 }
   0x2   :  { %10 = vsyncpa [#allocation4], 0  ;;  %s1261_s12 = smov [#allocation5]   ;;  %s1167_s16 = scalar_lea.hbm %s1669_s1, 16384 }
   0x3   :  { %s28_s13 = sshll.u32 %s1261_s12, 4  ;;  %p1168_p0 = scmp.ne.s32.totalorder %s1669_s1, %s1167_s16  ;;  %s29_s13 = int_to_ptr.vmem [resolvable:$true] %s28_s13 }
   0x4   :  { %p1171_p1 = scmp.lt.u32.totalorder %s1167_s16, %s1669_s1 }
   0x6   :  { %p1173_p2 = pnand %p1171_p1, %p1168_p0 }
   0x8   :  { %1176 = shalt.err (!%p1173_p2)
}
   0x9   :  { %s1177_s21 = scalar_lea.vmem %s29_s13, 16384  ;;  %p1182_p4 = scmp.lt.s32.totalorder %s29_s13, %s29_s13 }
   0xa   :  { %p1178_p3 = scmp.ne.s32.totalorder %s29_s13, %s1177_s21  ;;  %p1183_p5 = scmp.lt.s32.totalorder %s1177_s21, %s1177_s21 }
   0xc   :  { %p1184_p6 = por %p1183_p5, %p1182_p4 }
   0xe   :  { %p1185_p7 = pnand %p1184_p6, %p1178_p3 }
  0x10   :  { %1188 = shalt.err (!%p1185_p7)
}
  0x11   :  { %s1262_s22 = smov 1024   ;;  %s1263_s23 = smov 64  }
  0x12   :  { %34 = dma.hbm_to_vmem [thread:$0]  %s1669_s1, 16384, %s29_s13, [#allocation6], %s1262_s22, %s1262_s22, %s1263_s23  }
  0x13   :  { %s1264_s26 = smov [#allocation2]   ;;  %s1189_s30 = scalar_lea.hbm %s1668_s0, 2048 }
  0x14   :  { %s16_s27 = sshll.u32 %s1264_s26, 4  ;;  %p1190_p8 = scmp.ne.s32.totalorder %s1668_s0, %s1189_s30  ;;  %s17_s27 = int_to_ptr.vmem [resolvable:$true] %s16_s27 }
  0x15   :  { %p1193_p9 = scmp.lt.u32.totalorder %s1189_s30, %s1668_s0 }
  0x17   :  { %p1195_p10 = pnand %p1193_p9, %p1190_p8 }
  0x19   :  { %1198 = shalt.err (!%p1195_p10)
}
  0x1a   :  { %s1199_s8 = scalar_lea.vmem %s17_s27, 2048  ;;  %p1204_p12 = scmp.lt.s32.totalorder %s17_s27, %s17_s27 }
  0x1b   :  { %p1200_p11 = scmp.ne.s32.totalorder %s17_s27, %s1199_s8  ;;  %p1205_p13 = scmp.lt.s32.totalorder %s1199_s8, %s1199_s8 }
  0x1d   :  { %p1206_p0 = por %p1205_p13, %p1204_p12 }
  0x1f   :  { %p1207_p1 = pnand %p1206_p0, %p1200_p11 }
  0x21   :  { %1210 = shalt.err (!%p1207_p1)
}
  0x22   :  { %s1265_s1 = smov 128   ;;  %s1266_s9 = smov 8  }
  0x23   :  { %22 = dma.hbm_to_vmem [thread:$0]  %s1668_s0, 2048, %s17_s27, [#allocation3], %s1265_s1, %s1265_s1, %s1266_s9  }
  0x24   :  { %s1267_s12 = smov [#allocation7]   ;;  %s1211_s16 = scalar_lea.hbm %s1670_s2, 128 }
  0x25   :  { %s41_s13 = sshll.u32 %s1267_s12, 4  ;;  %p1212_p2 = scmp.ne.s32.totalorder %s1670_s2, %s1211_s16  ;;  %s42_s13 = int_to_ptr.vmem [resolvable:$true] %s41_s13 }
  0x26   :  { %p1215_p3 = scmp.lt.u32.totalorder %s1211_s16, %s1670_s2 }
  0x28   :  { %p1217_p4 = pnand %p1215_p3, %p1212_p2 }
  0x2a   :  { %1220 = shalt.err (!%p1217_p4)
}
  0x2b   :  { %s1221_s21 = scalar_lea.vmem %s42_s13, 128  ;;  %p1226_p6 = scmp.lt.s32.totalorder %s42_s13, %s42_s13 }
  0x2c   :  { %p1222_p5 = scmp.ne.s32.totalorder %s42_s13, %s1221_s21  ;;  %p1227_p7 = scmp.lt.s32.totalorder %s1221_s21, %s1221_s21 }
  0x2e   :  { %p1228_p8 = por %p1227_p7, %p1226_p6 }
  0x30   :  { %p1229_p9 = pnand %p1228_p8, %p1222_p5 }
  0x32   :  { %1232 = shalt.err (!%p1229_p9)
}
  0x33   :  { %44 = dma.hbm_to_vmem [thread:$0]  %s1670_s2, 128, %s42_s13, [#allocation6]  }
  0x34   :  { %1255 = dma.done.wait [#allocation3], 2048  }
  0x35   :  { %1256 = vsyncadd [#allocation3], 4294965248 }
  0x36   :  { %1257 = dma.done.wait [#allocation6], 16512  }
  0x37   :  { %1258 = vsyncadd [#allocation6], 4294950784  ;;  %v1268_v0 = vmov 0.0   ;;  %v55_v1 = vld [vmem:[#allocation5 + $0x8] sm:$0xff]  ;;  %v57_v3 = vld [vmem:[#allocation5 + $0x18] sm:$0xff]  ;;  %s1269_s2 = smov [#allocation8]  }
  0x38   :  { %304 = vmatprep.mubr.f32.mxu0 %v1268_v0  ;;  %465 = vmatprep.mubr.f32.mxu1 %v1268_v0  ;;  %v63_v2 = vld [vmem:[#allocation5 + $0x48] sm:$0xff]  ;;  %v65_v5 = vld [vmem:[#allocation5 + $0x58] sm:$0xff]  ;;  %v54_v6 = vld [vmem:[#allocation5] sm:$0xff]  ;;  %s1017_s25 = sshll.u32 %s1269_s2, 4  ;;  %s1018_s25 = int_to_ptr.vmem [resolvable:$true] %s1017_s25 }
  0x39   :  { %v1030_v4 = vpack.c.bf16 %v63_v2, %v55_v1  ;;  %v62_v7 = vld [vmem:[#allocation5 + $0x40] sm:$0xff]  ;;  %v1062_v8 = vpack.c.bf16 %v65_v5, %v57_v3  ;;  %v56_v10 = vld [vmem:[#allocation5 + $0x10] sm:$0xff]  ;;  %v71_v12 = vld [vmem:[#allocation5 + $0x88] sm:$0xff]  ;;  %s1233_s26 = scalar_lea.vmem %s1018_s25, 16384  ;;  %p1238_p11 = scmp.lt.s32.totalorder %s1018_s25, %s1018_s25 }
  0x3a   :  { %v1032_v9 = vpack.c.bf16 %v62_v7, %v54_v6  ;;  %v64_v11 = vld [vmem:[#allocation5 + $0x50] sm:$0xff]  ;;  %v79_v14 = vld [vmem:[#allocation5 + $0xc8] sm:$0xff]  ;;  %v73_v15 = vld [vmem:[#allocation5 + $0x98] sm:$0xff]  ;;  %p1234_p10 = scmp.ne.s32.totalorder %s1018_s25, %s1233_s26  ;;  %p1239_p12 = scmp.lt.s32.totalorder %s1233_s26, %s1233_s26 }
  0x3b   :  { %1031 = vmatprep.subr.bf16.mxu0 %v1030_v4  ;;  %v1064_v13 = vpack.c.bf16 %v64_v11, %v56_v10  ;;  %v81_v16 = vld [vmem:[#allocation5 + $0xd8] sm:$0xff]  ;;  %1063 = vmatprep.subr.bf16.mxu1 %v1062_v8  ;;  %v1034_v17 = vpack.c.bf16 %v79_v14, %v71_v12  ;;  %v70_v19 = vld [vmem:[#allocation5 + $0x80] sm:$0xff]  ;;  %v72_v21 = vld [vmem:[#allocation5 + $0x90] sm:$0xff] }
  0x3c   :  { %1033 = vmatpush1.bf16.msra.mxu0 %v1032_v9  ;;  %v1066_v18 = vpack.c.bf16 %v81_v16, %v73_v15  ;;  %v78_v20 = vld [vmem:[#allocation5 + $0xc0] sm:$0xff]  ;;  %v80_v23 = vld [vmem:[#allocation5 + $0xd0] sm:$0xff]  ;;  %v87_v24 = vld [vmem:[#allocation5 + $0x108] sm:$0xff]  ;;  %p1240_p13 = por %p1239_p12, %p1238_p11 }
  0x3d   :  { %1065 = vmatpush1.bf16.msra.mxu1 %v1064_v13  ;;  %v1036_v22 = vpack.c.bf16 %v78_v20, %v70_v19  ;;  %v95_v25 = vld [vmem:[#allocation5 + $0x148] sm:$0xff]  ;;  %1035 = vmatprep.subr.bf16.mxu0 %v1034_v17  ;;  %v1068_v26 = vpack.c.bf16 %v80_v23, %v72_v21  ;;  %v89_v28 = vld [vmem:[#allocation5 + $0x118] sm:$0xff]  ;;  %v86_v30 = vld [vmem:[#allocation5 + $0x100] sm:$0xff] }
  0x3e   :  { %1067 = vmatprep.subr.bf16.mxu1 %v1066_v18  ;;  %v1038_v27 = vpack.c.bf16 %v95_v25, %v87_v24  ;;  %v97_v29 = vld [vmem:[#allocation5 + $0x158] sm:$0xff]  ;;  %v94_v32 = vld [vmem:[#allocation5 + $0x140] sm:$0xff]  ;;  %v88_v33 = vld [vmem:[#allocation5 + $0x110] sm:$0xff]  ;;  %p1241_p0 = pnand %p1240_p13, %p1234_p10 }
  0x3f   :  { %v1070_v31 = vpack.c.bf16 %v97_v29, %v89_v28  ;;  %v96_v34 = vld [vmem:[#allocation5 + $0x150] sm:$0xff]  ;;  %v1040_v35 = vpack.c.bf16 %v94_v32, %v86_v30  ;;  %v103_v36 = vld [vmem:[#allocation5 + $0x188] sm:$0xff]  ;;  %v105_v38 = vld [vmem:[#allocation5 + $0x198] sm:$0xff] }
  0x40   :  { %1037 = vmatpush1.bf16.msra.mxu0 %v1036_v22  ;;  %v111_v37 = vld [vmem:[#allocation5 + $0x1c8] sm:$0xff]  ;;  %v1072_v39 = vpack.c.bf16 %v96_v34, %v88_v33  ;;  %v113_v41 = vld [vmem:[#allocation5 + $0x1d8] sm:$0xff]  ;;  %v102_v42 = vld [vmem:[#allocation5 + $0x180] sm:$0xff] }
  0x41   :  { %1069 = vmatpush1.bf16.msra.mxu1 %v1068_v26  ;;  %1039 = vmatprep.subr.bf16.mxu0 %v1038_v27  ;;  %v1042_v40 = vpack.c.bf16 %v111_v37, %v103_v36  ;;  %v110_v43 = vld [vmem:[#allocation5 + $0x1c0] sm:$0xff]  ;;  %v1074_v44 = vpack.c.bf16 %v113_v41, %v105_v38  ;;  %v104_v45 = vld [vmem:[#allocation5 + $0x190] sm:$0xff]  ;;  %v119_v47 = vld [vmem:[#allocation5 + $0x208] sm:$0xff] }
  0x42   :  { %1071 = vmatprep.subr.bf16.mxu1 %v1070_v31  ;;  %v112_v46 = vld [vmem:[#allocation5 + $0x1d0] sm:$0xff]  ;;  %v127_v48 = vld [vmem:[#allocation5 + $0x248] sm:$0xff]  ;;  %v121_v49 = vld [vmem:[#allocation5 + $0x218] sm:$0xff]  ;;  %v1044_v51 = vpack.c.bf16 %v110_v43, %v102_v42 }
  0x43   :  { %v129_v50 = vld [vmem:[#allocation5 + $0x258] sm:$0xff]  ;;  %v1076_v52 = vpack.c.bf16 %v112_v46, %v104_v45  ;;  %v1046_v53 = vpack.c.bf16 %v127_v48, %v119_v47  ;;  %v118_v54 = vld [vmem:[#allocation5 + $0x200] sm:$0xff]  ;;  %v120_v56 = vld [vmem:[#allocation5 + $0x210] sm:$0xff] }
  0x44   :  { %1041 = vmatpush1.bf16.msra.mxu0 %v1040_v35  ;;  %v126_v55 = vld [vmem:[#allocation5 + $0x240] sm:$0xff]  ;;  %v1078_v57 = vpack.c.bf16 %v129_v50, %v121_v49  ;;  %v128_v58 = vld [vmem:[#allocation5 + $0x250] sm:$0xff]  ;;  %v135_v59 = vld [vmem:[#allocation5 + $0x288] sm:$0xff] }
  0x45   :  { %1073 = vmatpush1.bf16.msra.mxu1 %v1072_v39  ;;  %1043 = vmatprep.subr.bf16.mxu0 %v1042_v40  ;;  %v143_v60 = vld [vmem:[#allocation5 + $0x2c8] sm:$0xff]  ;;  %v137_v61 = vld [vmem:[#allocation5 + $0x298] sm:$0xff]  ;;  %v1048_v63 = vpack.c.bf16 %v126_v55, %v118_v54  ;;  %v1080_v1 = vpack.c.bf16 %v128_v58, %v120_v56  ;;  %v134_v3 = vld [vmem:[#allocation5 + $0x280] sm:$0xff] }
  0x46   :  { %1075 = vmatprep.subr.bf16.mxu1 %v1074_v44  ;;  %v145_v62 = vld [vmem:[#allocation5 + $0x2d8] sm:$0xff]  ;;  %v1050_v2 = vpack.c.bf16 %v143_v60, %v135_v59  ;;  %v142_v4 = vld [vmem:[#allocation5 + $0x2c0] sm:$0xff]  ;;  %v136_v5 = vld [vmem:[#allocation5 + $0x290] sm:$0xff] }
  0x47   :  { %v1082_v6 = vpack.c.bf16 %v145_v62, %v137_v61  ;;  %v144_v7 = vld [vmem:[#allocation5 + $0x2d0] sm:$0xff]  ;;  %v151_v8 = vld [vmem:[#allocation5 + $0x308] sm:$0xff]  ;;  %v153_v10 = vld [vmem:[#allocation5 + $0x318] sm:$0xff]  ;;  %v1052_v12 = vpack.c.bf16 %v142_v4, %v134_v3 }
  0x48   :  { %1045 = vmatpush1.bf16.msra.mxu0 %v1044_v51  ;;  %v159_v9 = vld [vmem:[#allocation5 + $0x348] sm:$0xff]  ;;  %v161_v11 = vld [vmem:[#allocation5 + $0x358] sm:$0xff]  ;;  %v1084_v13 = vpack.c.bf16 %v144_v7, %v136_v5  ;;  %v150_v15 = vld [vmem:[#allocation5 + $0x300] sm:$0xff] }
  0x49   :  { %1077 = vmatpush1.bf16.msra.mxu1 %v1076_v52  ;;  %1047 = vmatprep.subr.bf16.mxu0 %v1046_v53  ;;  %v1054_v14 = vpack.c.bf16 %v159_v9, %v151_v8  ;;  %v158_v16 = vld [vmem:[#allocation5 + $0x340] sm:$0xff]  ;;  %v152_v17 = vld [vmem:[#allocation5 + $0x310] sm:$0xff]  ;;  %v1086_v18 = vpack.c.bf16 %v161_v11, %v153_v10  ;;  %v167_v20 = vld [vmem:[#allocation5 + $0x388] sm:$0xff] }
  0x4a   :  { %1079 = vmatprep.subr.bf16.mxu1 %v1078_v57  ;;  %v160_v19 = vld [vmem:[#allocation5 + $0x350] sm:$0xff]  ;;  %v175_v21 = vld [vmem:[#allocation5 + $0x3c8] sm:$0xff]  ;;  %v169_v22 = vld [vmem:[#allocation5 + $0x398] sm:$0xff]  ;;  %v1056_v24 = vpack.c.bf16 %v158_v16, %v150_v15 }
  0x4b   :  { %v177_v23 = vld [vmem:[#allocation5 + $0x3d8] sm:$0xff]  ;;  %v1088_v25 = vpack.c.bf16 %v160_v19, %v152_v17  ;;  %v1058_v26 = vpack.c.bf16 %v175_v21, %v167_v20  ;;  %v166_v27 = vld [vmem:[#allocation5 + $0x380] sm:$0xff]  ;;  %v168_v29 = vld [vmem:[#allocation5 + $0x390] sm:$0xff] }
  0x4c   :  { %1049 = vmatpush1.bf16.msra.mxu0 %v1048_v63  ;;  %v174_v28 = vld [vmem:[#allocation5 + $0x3c0] sm:$0xff]  ;;  %v1090_v30 = vpack.c.bf16 %v177_v23, %v169_v22  ;;  %v176_v31 = vld [vmem:[#allocation5 + $0x3d0] sm:$0xff]  ;;  %v59_v32 = vld [vmem:[#allocation5 + $0x28] sm:$0xff] }
  0x4d   :  { %1081 = vmatpush1.bf16.msra.mxu1 %v1080_v1  ;;  %1051 = vmatprep.subr.bf16.mxu0 %v1050_v2  ;;  %v67_v33 = vld [vmem:[#allocation5 + $0x68] sm:$0xff]  ;;  %v61_v34 = vld [vmem:[#allocation5 + $0x38] sm:$0xff]  ;;  %v1060_v36 = vpack.c.bf16 %v174_v28, %v166_v27  ;;  %v1092_v37 = vpack.c.bf16 %v176_v31, %v168_v29  ;;  %v58_v39 = vld [vmem:[#allocation5 + $0x20] sm:$0xff] }
  0x4e   :  { %1083 = vmatprep.subr.bf16.mxu1 %v1082_v6  ;;  %v69_v35 = vld [vmem:[#allocation5 + $0x78] sm:$0xff]  ;;  %v1094_v38 = vpack.c.bf16 %v67_v33, %v59_v32  ;;  %v66_v40 = vld [vmem:[#allocation5 + $0x60] sm:$0xff]  ;;  %v60_v42 = vld [vmem:[#allocation5 + $0x30] sm:$0xff] }
  0x4f   :  { %v1126_v41 = vpack.c.bf16 %v69_v35, %v61_v34  ;;  %v68_v43 = vld [vmem:[#allocation5 + $0x70] sm:$0xff]  ;;  %v75_v44 = vld [vmem:[#allocation5 + $0xa8] sm:$0xff]  ;;  %v1331_v46 = vld [vmem:[#allocation2] sm:$0xff]  ;;  %v1096_v47 = vpack.c.bf16 %v66_v40, %v58_v39 }
  0x50   :  { %1053 = vmatpush1.bf16.msra.mxu0 %v1052_v12  ;;  %v83_v45 = vld [vmem:[#allocation5 + $0xe8] sm:$0xff]  ;;  %v77_v48 = vld [vmem:[#allocation5 + $0xb8] sm:$0xff]  ;;  %v1128_v50 = vpack.c.bf16 %v68_v43, %v60_v42  ;;  %v74_v52 = vld [vmem:[#allocation5 + $0xa0] sm:$0xff] }
  0x51   :  { %1085 = vmatpush1.bf16.msra.mxu1 %v1084_v13  ;;  %1055 = vmatprep.subr.bf16.mxu0 %v1054_v14  ;;  %v85_v49 = vld [vmem:[#allocation5 + $0xf8] sm:$0xff]  ;;  %v1098_v51 = vpack.c.bf16 %v83_v45, %v75_v44  ;;  %v82_v53 = vld [vmem:[#allocation5 + $0xe0] sm:$0xff]  ;;  %v76_v54 = vld [vmem:[#allocation5 + $0xb0] sm:$0xff] }
  0x52   :  { %1087 = vmatprep.subr.bf16.mxu1 %v1086_v18  ;;  %v1130_v55 = vpack.c.bf16 %v85_v49, %v77_v48  ;;  %v84_v56 = vld [vmem:[#allocation5 + $0xf0] sm:$0xff]  ;;  %v91_v57 = vld [vmem:[#allocation5 + $0x128] sm:$0xff]  ;;  %v93_v60 = vld [vmem:[#allocation5 + $0x138] sm:$0xff]  ;;  %v1100_v62 = vpack.c.bf16 %v82_v53, %v74_v52 }
  0x53   :  { %v99_v58 = vld [vmem:[#allocation5 + $0x168] sm:$0xff]  ;;  %v101_v61 = vld [vmem:[#allocation5 + $0x178] sm:$0xff]  ;;  %v1132_v63 = vpack.c.bf16 %v84_v56, %v76_v54  ;;  %v90_v2 = vld [vmem:[#allocation5 + $0x120] sm:$0xff] }
  0x54   :  { %1057 = vmatpush1.bf16.msra.mxu0 %v1056_v24  ;;  %v1335_v59 = vld [vmem:[#allocation2 + $0x8] sm:$0xff]  ;;  %v1102_v1 = vpack.c.bf16 %v99_v58, %v91_v57  ;;  %v98_v3 = vld [vmem:[#allocation5 + $0x160] sm:$0xff]  ;;  %v92_v4 = vld [vmem:[#allocation5 + $0x130] sm:$0xff]  ;;  %v1134_v5 = vpack.c.bf16 %v101_v61, %v93_v60 }
  0x55   :  { %1089 = vmatpush1.bf16.msra.mxu1 %v1088_v25  ;;  %1059 = vmatprep.subr.bf16.mxu0 %v1058_v26  ;;  %v100_v6 = vld [vmem:[#allocation5 + $0x170] sm:$0xff]  ;;  %v107_v7 = vld [vmem:[#allocation5 + $0x1a8] sm:$0xff]  ;;  %v109_v10 = vld [vmem:[#allocation5 + $0x1b8] sm:$0xff]  ;;  %v1104_v12 = vpack.c.bf16 %v98_v3, %v90_v2 }
  0x56   :  { %1091 = vmatprep.subr.bf16.mxu1 %v1090_v30  ;;  %v115_v8 = vld [vmem:[#allocation5 + $0x1e8] sm:$0xff]  ;;  %v1342_v9 = vld [vmem:[#allocation2 + $0x10] sm:$0xff]  ;;  %v117_v11 = vld [vmem:[#allocation5 + $0x1f8] sm:$0xff]  ;;  %v1136_v13 = vpack.c.bf16 %v100_v6, %v92_v4 }
  0x57   :  { %v1106_v14 = vpack.c.bf16 %v115_v8, %v107_v7  ;;  %v106_v15 = vld [vmem:[#allocation5 + $0x1a0] sm:$0xff]  ;;  %v108_v17 = vld [vmem:[#allocation5 + $0x1b0] sm:$0xff]  ;;  %v1138_v18 = vpack.c.bf16 %v117_v11, %v109_v10  ;;  %v123_v20 = vld [vmem:[#allocation5 + $0x228] sm:$0xff] }
  0x58   :  { %1061 = vmatpush1.bf16.msra.mxu0 %v1060_v36  ;;  %v114_v16 = vld [vmem:[#allocation5 + $0x1e0] sm:$0xff]  ;;  %v116_v19 = vld [vmem:[#allocation5 + $0x1f0] sm:$0xff]  ;;  %v131_v21 = vld [vmem:[#allocation5 + $0x268] sm:$0xff] }
  0x59   :  { %1093 = vmatpush1.bf16.msra.mxu1 %v1092_v37  ;;  %1095 = vmatprep.subr.bf16.mxu0 %v1094_v38  ;;  %v1348_v22 = vld [vmem:[#allocation2 + $0x18] sm:$0xff]  ;;  %v1108_v25 = vpack.c.bf16 %v114_v16, %v106_v15  ;;  %v1140_v26 = vpack.c.bf16 %v116_v19, %v108_v17  ;;  %v1110_v27 = vpack.c.bf16 %v131_v21, %v123_v20  ;;  %v122_v28 = vld [vmem:[#allocation5 + $0x220] sm:$0xff]  ;;  %v124_v30 = vld [vmem:[#allocation5 + $0x230] sm:$0xff] }
  0x5a   :  { %1127 = vmatprep.subr.bf16.mxu1 %v1126_v41  ;;  %v125_v23 = vld [vmem:[#allocation5 + $0x238] sm:$0xff]  ;;  %v130_v29 = vld [vmem:[#allocation5 + $0x260] sm:$0xff]  ;;  %v132_v32 = vld [vmem:[#allocation5 + $0x270] sm:$0xff] }
  0x5b   :  { %305 = vmatmul.mubr.f32.vlgmr.msra.gmra.mrb[0].mxu0 %v1331_v46  ;;  %v133_v24 = vld [vmem:[#allocation5 + $0x278] sm:$0xff]  ;;  %v139_v33 = vld [vmem:[#allocation5 + $0x2a8] sm:$0xff]  ;;  %v1354_v35 = vld [vmem:[#allocation2 + $0x20] sm:$0xff]  ;;  %v1112_v38 = vpack.c.bf16 %v130_v29, %v122_v28  ;;  %v1144_v39 = vpack.c.bf16 %v132_v32, %v124_v30 }
  0x5c   :  { %466 = vmatmul.mubr.f32.vlgmr.msra.gmra.mrb[0].mxu1 %v1331_v46  ;;  %1097 = vmatpush1.bf16.msra.mxu0 %v1096_v47  ;;  %v1142_v31 = vpack.c.bf16 %v133_v24, %v125_v23  ;;  %v147_v34 = vld [vmem:[#allocation5 + $0x2e8] sm:$0xff]  ;;  %v141_v36 = vld [vmem:[#allocation5 + $0x2b8] sm:$0xff]  ;;  %v138_v41 = vld [vmem:[#allocation5 + $0x2a0] sm:$0xff] }
  0x5d   :  { %1129 = vmatpush1.bf16.msra.mxu1 %v1128_v50  ;;  %310 = vmatprep.mubr.f32.mxu0 %v1268_v0  ;;  %v149_v37 = vld [vmem:[#allocation5 + $0x2f8] sm:$0xff]  ;;  %v1114_v40 = vpack.c.bf16 %v147_v34, %v139_v33  ;;  %v146_v42 = vld [vmem:[#allocation5 + $0x2e0] sm:$0xff]  ;;  %v140_v43 = vld [vmem:[#allocation5 + $0x2b0] sm:$0xff] }
  0x5e   :  { %471 = vmatprep.mubr.f32.mxu1 %v1268_v0  ;;  %1099 = vmatprep.subr.bf16.mxu0 %v1098_v51  ;;  %v1146_v44 = vpack.c.bf16 %v149_v37, %v141_v36  ;;  %v148_v45 = vld [vmem:[#allocation5 + $0x2f0] sm:$0xff]  ;;  %v155_v47 = vld [vmem:[#allocation5 + $0x328] sm:$0xff]  ;;  %v157_v50 = vld [vmem:[#allocation5 + $0x338] sm:$0xff]  ;;  %v1116_v52 = vpack.c.bf16 %v146_v42, %v138_v41 }
  0x5f   :  { %311 = vmatmul.mubr.f32.gmra.mrb[2].mxu0 %v1335_v59  ;;  %1131 = vmatprep.subr.bf16.mxu1 %v1130_v55  ;;  %v163_v48 = vld [vmem:[#allocation5 + $0x368] sm:$0xff]  ;;  %v165_v51 = vld [vmem:[#allocation5 + $0x378] sm:$0xff]  ;;  %v1148_v53 = vpack.c.bf16 %v148_v45, %v140_v43  ;;  %v154_v55 = vld [vmem:[#allocation5 + $0x320] sm:$0xff] }
  0x60   :  { %472 = vmatmul.mubr.f32.gmra.mrb[2].mxu1 %v1335_v59  ;;  %316 = vmatprep.mubr.f32.mxu0 %v1268_v0  ;;  %v1360_v49 = vld [vmem:[#allocation2 + $0x28] sm:$0xff]  ;;  %v1118_v54 = vpack.c.bf16 %v163_v48, %v155_v47  ;;  %v162_v56 = vld [vmem:[#allocation5 + $0x360] sm:$0xff]  ;;  %v156_v57 = vld [vmem:[#allocation5 + $0x330] sm:$0xff]  ;;  %v1150_v58 = vpack.c.bf16 %v165_v51, %v157_v50 }
  0x61   :  { %477 = vmatprep.mubr.f32.mxu1 %v1268_v0  ;;  %1101 = vmatpush1.bf16.msra.mxu0 %v1100_v62  ;;  %v164_v60 = vld [vmem:[#allocation5 + $0x370] sm:$0xff]  ;;  %v171_v61 = vld [vmem:[#allocation5 + $0x3a8] sm:$0xff]  ;;  %v181_v2 = vld [vmem:[#allocation5 + $0x3f8] sm:$0xff]  ;;  %v1120_v3 = vpack.c.bf16 %v162_v56, %v154_v55 }
  0x62   :  { %1133 = vmatpush1.bf16.msra.mxu1 %v1132_v63  ;;  %1103 = vmatprep.subr.bf16.mxu0 %v1102_v1  ;;  %v179_v62 = vld [vmem:[#allocation5 + $0x3e8] sm:$0xff]  ;;  %v1366_v63 = vld [vmem:[#allocation2 + $0x30] sm:$0xff]  ;;  %v173_v1 = vld [vmem:[#allocation5 + $0x3b8] sm:$0xff]  ;;  %v1152_v4 = vpack.c.bf16 %v164_v60, %v156_v57 }
  0x63   :  { %317 = vmatmul.mubr.f32.gmra.mrb[4].mxu0 %v1342_v9  ;;  %1135 = vmatprep.subr.bf16.mxu1 %v1134_v5  ;;  %v1122_v5 = vpack.c.bf16 %v179_v62, %v171_v61  ;;  %v170_v6 = vld [vmem:[#allocation5 + $0x3a0] sm:$0xff]  ;;  %v1154_v8 = vpack.c.bf16 %v181_v2, %v173_v1  ;;  %v172_v10 = vld [vmem:[#allocation5 + $0x3b0] sm:$0xff]  ;;  %v1384_v16 = vld [vmem:[#allocation2 + $0x48] sm:$0xff] }
  0x64   :  { %478 = vmatmul.mubr.f32.gmra.mrb[4].mxu1 %v1342_v9  ;;  %322 = vmatprep.mubr.f32.mxu0 %v1268_v0  ;;  %v178_v7 = vld [vmem:[#allocation5 + $0x3e0] sm:$0xff]  ;;  %v180_v11 = vld [vmem:[#allocation5 + $0x3f0] sm:$0xff]  ;;  %v1408_v20 = vld [vmem:[#allocation2 + $0x68] sm:$0xff] }
  0x65   :  { %483 = vmatprep.mubr.f32.mxu1 %v1268_v0  ;;  %1105 = vmatpush1.bf16.msra.mxu0 %v1104_v12  ;;  %v1372_v12 = vld [vmem:[#allocation2 + $0x38] sm:$0xff]  ;;  %v1378_v15 = vld [vmem:[#allocation2 + $0x40] sm:$0xff]  ;;  %v1390_v17 = vld [vmem:[#allocation2 + $0x50] sm:$0xff] }
  0x66   :  { %1137 = vmatpush1.bf16.msra.mxu1 %v1136_v13  ;;  %1107 = vmatprep.subr.bf16.mxu0 %v1106_v14  ;;  %v1124_v13 = vpack.c.bf16 %v178_v7, %v170_v6  ;;  %v1156_v14 = vpack.c.bf16 %v180_v11, %v172_v10  ;;  %v1402_v19 = vld [vmem:[#allocation2 + $0x60] sm:$0xff]  ;;  %v1414_v21 = vld [vmem:[#allocation2 + $0x70] sm:$0xff]  ;;  %v1420_v23 = vld [vmem:[#allocation2 + $0x78] sm:$0xff] }
  0x67   :  { %323 = vmatmul.mubr.f32.gmra.mrb[6].mxu0 %v1348_v22  ;;  %1139 = vmatprep.subr.bf16.mxu1 %v1138_v18  ;;  %v1396_v18 = vld [vmem:[#allocation2 + $0x58] sm:$0xff] }
  0x68   :  { %484 = vmatmul.mubr.f32.gmra.mrb[6].mxu1 %v1348_v22  ;;  %328 = vmatprep.mubr.f32.mxu0 %v1268_v0 }
  0x69   :  { %489 = vmatprep.mubr.f32.mxu1 %v1268_v0  ;;  %1109 = vmatpush1.bf16.msra.mxu0 %v1108_v25 }
  0x6a   :  { %1141 = vmatpush1.bf16.msra.mxu1 %v1140_v26  ;;  %1111 = vmatprep.subr.bf16.mxu0 %v1110_v27 }
  0x6b   :  { %329 = vmatmul.mubr.f32.gmra.mrb[8].mxu0 %v1354_v35  ;;  %1143 = vmatprep.subr.bf16.mxu1 %v1142_v31 }
  0x6c   :  { %490 = vmatmul.mubr.f32.gmra.mrb[8].mxu1 %v1354_v35  ;;  %334 = vmatprep.mubr.f32.mxu0 %v1268_v0 }
  0x6d   :  { %495 = vmatprep.mubr.f32.mxu1 %v1268_v0  ;;  %1113 = vmatpush1.bf16.msra.mxu0 %v1112_v38 }
  0x6e   :  { %1145 = vmatpush1.bf16.msra.mxu1 %v1144_v39  ;;  %1115 = vmatprep.subr.bf16.mxu0 %v1114_v40 }
  0x6f   :  { %335 = vmatmul.mubr.f32.gmra.mrb[10].mxu0 %v1360_v49  ;;  %1147 = vmatprep.subr.bf16.mxu1 %v1146_v44 }
  0x70   :  { %496 = vmatmul.mubr.f32.gmra.mrb[10].mxu1 %v1360_v49  ;;  %340 = vmatprep.mubr.f32.mxu0 %v1268_v0 }
  0x71   :  { %501 = vmatprep.mubr.f32.mxu1 %v1268_v0  ;;  %1117 = vmatpush1.bf16.msra.mxu0 %v1116_v52 }
  0x72   :  { %1149 = vmatpush1.bf16.msra.mxu1 %v1148_v53  ;;  %1119 = vmatprep.subr.bf16.mxu0 %v1118_v54 }
  0x73   :  { %341 = vmatmul.mubr.f32.gmra.mrb[12].mxu0 %v1366_v63  ;;  %1151 = vmatprep.subr.bf16.mxu1 %v1150_v58 }
  0x74   :  { %502 = vmatmul.mubr.f32.gmra.mrb[12].mxu1 %v1366_v63  ;;  %346 = vmatprep.mubr.f32.mxu0 %v1268_v0 }
  0x75   :  { %507 = vmatprep.mubr.f32.mxu1 %v1268_v0  ;;  %1121 = vmatpush1.bf16.msra.mxu0 %v1120_v3 }
  0x76   :  { %1153 = vmatpush1.bf16.msra.mxu1 %v1152_v4  ;;  %1123 = vmatprep.subr.bf16.mxu0 %v1122_v5 }
  0x77   :  { %347 = vmatmul.mubr.f32.gmra.mrb[14].mxu0 %v1372_v12  ;;  %1155 = vmatprep.subr.bf16.mxu1 %v1154_v8 }
  0x78   :  { %508 = vmatmul.mubr.f32.gmra.mrb[14].mxu1 %v1372_v12  ;;  %352 = vmatprep.mubr.f32.mxu0 %v1268_v0 }
  0x79   :  { %513 = vmatprep.mubr.f32.mxu1 %v1268_v0  ;;  %1125 = vmatpush1.bf16.msra.mxu0 %v1124_v13 }
  0x7a   :  { %1157 = vmatpush1.bf16.msra.mxu1 %v1156_v14 }
  0x7b   :  { %353 = vmatmul.mubr.f32.gmra.mrb[16].mxu0 %v1378_v15 }
  0x7c   :  { %514 = vmatmul.mubr.f32.gmra.mrb[16].mxu1 %v1378_v15  ;;  %358 = vmatprep.mubr.f32.mxu0 %v1268_v0 }
  0x7d   :  { %519 = vmatprep.mubr.f32.mxu1 %v1268_v0 }
  0x7f   :  { %359 = vmatmul.mubr.f32.gmra.mrb[18].mxu0 %v1384_v16 }
  0x80   :  { %520 = vmatmul.mubr.f32.gmra.mrb[18].mxu1 %v1384_v16  ;;  %364 = vmatprep.mubr.f32.mxu0 %v1268_v0 }
  0x81   :  { %525 = vmatprep.mubr.f32.mxu1 %v1268_v0 }
  0x83   :  { %365 = vmatmul.mubr.f32.gmra.mrb[20].mxu0 %v1390_v17 }
  0x84   :  { %526 = vmatmul.mubr.f32.gmra.mrb[20].mxu1 %v1390_v17  ;;  %370 = vmatprep.mubr.f32.mxu0 %v1268_v0 }
  0x85   :  { %531 = vmatprep.mubr.f32.mxu1 %v1268_v0 }
  0x87   :  { %371 = vmatmul.mubr.f32.gmra.mrb[22].mxu0 %v1396_v18 }
  0x88   :  { %532 = vmatmul.mubr.f32.gmra.mrb[22].mxu1 %v1396_v18  ;;  %376 = vmatprep.mubr.f32.mxu0 %v1268_v0 }
  0x89   :  { %537 = vmatprep.mubr.f32.mxu1 %v1268_v0 }
  0x8b   :  { %377 = vmatmul.mubr.f32.gmra.mrb[24].mxu0 %v1402_v19 }
  0x8c   :  { %538 = vmatmul.mubr.f32.gmra.mrb[24].mxu1 %v1402_v19  ;;  %382 = vmatprep.mubr.f32.mxu0 %v1268_v0 }
  0x8d   :  { %543 = vmatprep.mubr.f32.mxu1 %v1268_v0 }
  0x8f   :  { %383 = vmatmul.mubr.f32.gmra.mrb[26].mxu0 %v1408_v20 }
  0x90   :  { %544 = vmatmul.mubr.f32.gmra.mrb[26].mxu1 %v1408_v20  ;;  %388 = vmatprep.mubr.f32.mxu0 %v1268_v0 }
  0x91   :  { %549 = vmatprep.mubr.f32.mxu1 %v1268_v0 }
  0x93   :  { %389 = vmatmul.mubr.f32.gmra.mrb[28].mxu0 %v1414_v21 }
  0x94   :  { %550 = vmatmul.mubr.f32.gmra.mrb[28].mxu1 %v1414_v21  ;;  %394 = vmatprep.mubr.f32.mxu0 %v1268_v0 }
  0x95   :  { %555 = vmatprep.mubr.f32.mxu1 %v1268_v0 }
  0x97   :  { %395 = vmatmul.mubr.f32.gmra.mrb[30].mxu0 %v1420_v23 }
  0x98   :  { %556 = vmatmul.mubr.f32.gmra.mrb[30].mxu1 %v1420_v23  ;;  %626 = vmatprep.mubr.f32.mxu0 %v1268_v0 }
  0x99   :  { %787 = vmatprep.mubr.f32.mxu1 %v1268_v0 }
  0x9b   :  { %627 = vmatmul.mubr.f32.vlgmr.msra.gmra.mrb[32].mxu0 %v1331_v46 }
  0x9c   :  { %788 = vmatmul.mubr.f32.vlgmr.msra.gmra.mrb[32].mxu1 %v1331_v46  ;;  %632 = vmatprep.mubr.f32.mxu0 %v1268_v0  ;;  %v200_v46 = vlaneseq }
  0x9d   :  { %793 = vmatprep.mubr.f32.mxu1 %v1268_v0 }
  0x9f   :  { %633 = vmatmul.mubr.f32.gmra.mrb[34].mxu0 %v1335_v59 }
  0xa0   :  { %794 = vmatmul.mubr.f32.gmra.mrb[34].mxu1 %v1335_v59  ;;  %638 = vmatprep.mubr.f32.mxu0 %v1268_v0  ;;  %v1489_v59 = vshrl.u32 %v200_v46, 7 }
  0xa1   :  { %799 = vmatprep.mubr.f32.mxu1 %v1268_v0 }
  0xa2   :  { %v210_v24 = vsub.s32 2, %v1489_v59  ;;  %v206_v25 = vsub.s32 1, %v1489_v59  ;;  %v214_v26 = vsub.s32 3, %v1489_v59 }
  0xa3   :  { %639 = vmatmul.mubr.f32.gmra.mrb[36].mxu0 %v1342_v9 }
  0xa4   :  { %800 = vmatmul.mubr.f32.gmra.mrb[36].mxu1 %v1342_v9  ;;  %644 = vmatprep.mubr.f32.mxu0 %v1268_v0  ;;  %v202_v9 = vsub.s32 0, %v1489_v59 }
  0xa5   :  { %805 = vmatprep.mubr.f32.mxu1 %v1268_v0 }
  0xa7   :  { %645 = vmatmul.mubr.f32.gmra.mrb[38].mxu0 %v1348_v22 }
  0xa8   :  { %806 = vmatmul.mubr.f32.gmra.mrb[38].mxu1 %v1348_v22  ;;  %650 = vmatprep.mubr.f32.mxu0 %v1268_v0  ;;  %v1492_v22 = vld [vmem:[#allocation7] sm:$0xff] }
  0xa9   :  { %811 = vmatprep.mubr.f32.mxu1 %v1268_v0  ;;  %v1498_v27 = vrot.slane %v1492_v22, %v202_v9  ;;  %v1504_v28 = vrot.slane %v1492_v22, %v206_v25  ;;  %v1507_v29 = vrot.slane %v1492_v22, %v214_v26 }
  0xab   :  { %651 = vmatmul.mubr.f32.gmra.mrb[40].mxu0 %v1354_v35 }
  0xac   :  { %812 = vmatmul.mubr.f32.gmra.mrb[40].mxu1 %v1354_v35  ;;  %656 = vmatprep.mubr.f32.mxu0 %v1268_v0 }
  0xad   :  { %817 = vmatprep.mubr.f32.mxu1 %v1268_v0 }
  0xaf   :  { %657 = vmatmul.mubr.f32.gmra.mrb[42].mxu0 %v1360_v49 }
  0xb0   :  { %818 = vmatmul.mubr.f32.gmra.mrb[42].mxu1 %v1360_v49  ;;  %662 = vmatprep.mubr.f32.mxu0 %v1268_v0 }
  0xb1   :  { %823 = vmatprep.mubr.f32.mxu1 %v1268_v0 }
  0xb3   :  { %663 = vmatmul.mubr.f32.gmra.mrb[44].mxu0 %v1366_v63 }
  0xb4   :  { %824 = vmatmul.mubr.f32.gmra.mrb[44].mxu1 %v1366_v63  ;;  %668 = vmatprep.mubr.f32.mxu0 %v1268_v0 }
  0xb5   :  { %829 = vmatprep.mubr.f32.mxu1 %v1268_v0 }
  0xb7   :  { %669 = vmatmul.mubr.f32.gmra.mrb[46].mxu0 %v1372_v12 }
  0xb8   :  { %830 = vmatmul.mubr.f32.gmra.mrb[46].mxu1 %v1372_v12  ;;  %674 = vmatprep.mubr.f32.mxu0 %v1268_v0 }
  0xb9   :  { %835 = vmatprep.mubr.f32.mxu1 %v1268_v0 }
  0xbb   :  { %675 = vmatmul.mubr.f32.gmra.mrb[48].mxu0 %v1378_v15 }
  0xbc   :  { %836 = vmatmul.mubr.f32.gmra.mrb[48].mxu1 %v1378_v15  ;;  %680 = vmatprep.mubr.f32.mxu0 %v1268_v0 }
  0xbd   :  { %841 = vmatprep.mubr.f32.mxu1 %v1268_v0 }
  0xbf   :  { %681 = vmatmul.mubr.f32.gmra.mrb[50].mxu0 %v1384_v16 }
  0xc0   :  { %842 = vmatmul.mubr.f32.gmra.mrb[50].mxu1 %v1384_v16  ;;  %686 = vmatprep.mubr.f32.mxu0 %v1268_v0 }
  0xc1   :  { %847 = vmatprep.mubr.f32.mxu1 %v1268_v0 }
  0xc3   :  { %687 = vmatmul.mubr.f32.gmra.mrb[52].mxu0 %v1390_v17 }
  0xc4   :  { %848 = vmatmul.mubr.f32.gmra.mrb[52].mxu1 %v1390_v17  ;;  %692 = vmatprep.mubr.f32.mxu0 %v1268_v0 }
  0xc5   :  { %853 = vmatprep.mubr.f32.mxu1 %v1268_v0 }
  0xc7   :  { %693 = vmatmul.mubr.f32.gmra.mrb[54].mxu0 %v1396_v18 }
  0xc8   :  { %854 = vmatmul.mubr.f32.gmra.mrb[54].mxu1 %v1396_v18  ;;  %698 = vmatprep.mubr.f32.mxu0 %v1268_v0 }
  0xc9   :  { %859 = vmatprep.mubr.f32.mxu1 %v1268_v0 }
  0xcb   :  { %699 = vmatmul.mubr.f32.gmra.mrb[56].mxu0 %v1402_v19 }
  0xcc   :  { %860 = vmatmul.mubr.f32.gmra.mrb[56].mxu1 %v1402_v19  ;;  %704 = vmatprep.mubr.f32.mxu0 %v1268_v0 }
  0xcd   :  { %865 = vmatprep.mubr.f32.mxu1 %v1268_v0 }
  0xcf   :  { %705 = vmatmul.mubr.f32.gmra.mrb[58].mxu0 %v1408_v20 }
  0xd0   :  { %866 = vmatmul.mubr.f32.gmra.mrb[58].mxu1 %v1408_v20  ;;  %710 = vmatprep.mubr.f32.mxu0 %v1268_v0 }
  0xd1   :  { %871 = vmatprep.mubr.f32.mxu1 %v1268_v0 }
  0xd3   :  { %711 = vmatmul.mubr.f32.gmra.mrb[60].mxu0 %v1414_v21 }
  0xd4   :  { %872 = vmatmul.mubr.f32.gmra.mrb[60].mxu1 %v1414_v21  ;;  %716 = vmatprep.mubr.f32.mxu0 %v1268_v0 }
  0xd5   :  { %877 = vmatprep.mubr.f32.mxu1 %v1268_v0  ;;  %v1501_v0 = vrot.slane %v1492_v22, %v210_v24 }
  0xd7   :  { %717 = vmatmul.mubr.f32.gmra.mrb[62].mxu0 %v1420_v23 }
  0xd8   :  { %878 = vmatmul.mubr.f32.gmra.mrb[62].mxu1 %v1420_v23 }
 0x12e   :  { %v306_v30 = vpop.f32.mrb[0].mxu0 }
 0x12f   :  { %v307_v31 = vadd.f32 %v306_v30, %v1498_v27  ;;  %v467_v32 = vpop.f32.mrb[0].mxu1  ;;  %v308_v33 = vpop.f32.mrb[1].mxu0 }
 0x130   :  { %v468_v34 = vadd.f32 %v467_v32, %v1501_v0  ;;  %v309_v35 = vadd.f32 %v308_v33, %v1504_v28  ;;  %v469_v36 = vpop.f32.mrb[1].mxu1 }
 0x131   :  { %884 = vst [vmem:[#allocation8] sm:$0xff] %v307_v31  ;;  %v470_v37 = vadd.f32 %v469_v36, %v1507_v29 }
 0x132   :  { %886 = vst [vmem:[#allocation8 + $0x10] sm:$0xff] %v468_v34  ;;  %885 = vst [vmem:[#allocation8 + $0x8] sm:$0xff] %v309_v35  ;;  %v312_v38 = vpop.f32.mrb[2].mxu0 }
 0x133   :  { %887 = vst [vmem:[#allocation8 + $0x18] sm:$0xff] %v470_v37  ;;  %v313_v39 = vadd.f32 %v312_v38, %v1498_v27  ;;  %v473_v40 = vpop.f32.mrb[2].mxu1  ;;  %v314_v41 = vpop.f32.mrb[3].mxu0 }
 0x134   :  { %v474_v42 = vadd.f32 %v473_v40, %v1501_v0  ;;  %v315_v43 = vadd.f32 %v314_v41, %v1504_v28  ;;  %v475_v44 = vpop.f32.mrb[3].mxu1 }
 0x135   :  { %892 = vst [vmem:[#allocation8 + $0x40] sm:$0xff] %v313_v39  ;;  %v476_v45 = vadd.f32 %v475_v44, %v1507_v29 }
 0x136   :  { %894 = vst [vmem:[#allocation8 + $0x50] sm:$0xff] %v474_v42  ;;  %893 = vst [vmem:[#allocation8 + $0x48] sm:$0xff] %v315_v43  ;;  %v318_v47 = vpop.f32.mrb[4].mxu0 }
 0x137   :  { %895 = vst [vmem:[#allocation8 + $0x58] sm:$0xff] %v476_v45  ;;  %v319_v48 = vadd.f32 %v318_v47, %v1498_v27  ;;  %v479_v49 = vpop.f32.mrb[4].mxu1  ;;  %v320_v50 = vpop.f32.mrb[5].mxu0 }
 0x138   :  { %v480_v51 = vadd.f32 %v479_v49, %v1501_v0  ;;  %v321_v52 = vadd.f32 %v320_v50, %v1504_v28  ;;  %v481_v53 = vpop.f32.mrb[5].mxu1 }
 0x139   :  { %900 = vst [vmem:[#allocation8 + $0x80] sm:$0xff] %v319_v48  ;;  %v482_v54 = vadd.f32 %v481_v53, %v1507_v29 }
 0x13a   :  { %902 = vst [vmem:[#allocation8 + $0x90] sm:$0xff] %v480_v51  ;;  %901 = vst [vmem:[#allocation8 + $0x88] sm:$0xff] %v321_v52  ;;  %v324_v55 = vpop.f32.mrb[6].mxu0 }
 0x13b   :  { %903 = vst [vmem:[#allocation8 + $0x98] sm:$0xff] %v482_v54  ;;  %v325_v56 = vadd.f32 %v324_v55, %v1498_v27  ;;  %v485_v57 = vpop.f32.mrb[6].mxu1  ;;  %v326_v58 = vpop.f32.mrb[7].mxu0 }
 0x13c   :  { %v486_v60 = vadd.f32 %v485_v57, %v1501_v0  ;;  %v327_v61 = vadd.f32 %v326_v58, %v1504_v28  ;;  %v487_v62 = vpop.f32.mrb[7].mxu1 }
 0x13d   :  { %908 = vst [vmem:[#allocation8 + $0xc0] sm:$0xff] %v325_v56  ;;  %v488_v63 = vadd.f32 %v487_v62, %v1507_v29 }
 0x13e   :  { %910 = vst [vmem:[#allocation8 + $0xd0] sm:$0xff] %v486_v60  ;;  %909 = vst [vmem:[#allocation8 + $0xc8] sm:$0xff] %v327_v61  ;;  %v330_v1 = vpop.f32.mrb[8].mxu0 }
 0x13f   :  { %911 = vst [vmem:[#allocation8 + $0xd8] sm:$0xff] %v488_v63  ;;  %v331_v2 = vadd.f32 %v330_v1, %v1498_v27  ;;  %v491_v3 = vpop.f32.mrb[8].mxu1  ;;  %v332_v4 = vpop.f32.mrb[9].mxu0 }
 0x140   :  { %v492_v5 = vadd.f32 %v491_v3, %v1501_v0  ;;  %v333_v6 = vadd.f32 %v332_v4, %v1504_v28  ;;  %v493_v7 = vpop.f32.mrb[9].mxu1 }
 0x141   :  { %916 = vst [vmem:[#allocation8 + $0x100] sm:$0xff] %v331_v2  ;;  %v494_v8 = vadd.f32 %v493_v7, %v1507_v29 }
 0x142   :  { %918 = vst [vmem:[#allocation8 + $0x110] sm:$0xff] %v492_v5  ;;  %917 = vst [vmem:[#allocation8 + $0x108] sm:$0xff] %v333_v6  ;;  %v336_v10 = vpop.f32.mrb[10].mxu0 }
 0x143   :  { %919 = vst [vmem:[#allocation8 + $0x118] sm:$0xff] %v494_v8  ;;  %v337_v11 = vadd.f32 %v336_v10, %v1498_v27  ;;  %v497_v12 = vpop.f32.mrb[10].mxu1  ;;  %v338_v13 = vpop.f32.mrb[11].mxu0 }
 0x144   :  { %v498_v14 = vadd.f32 %v497_v12, %v1501_v0  ;;  %v339_v15 = vadd.f32 %v338_v13, %v1504_v28  ;;  %v499_v16 = vpop.f32.mrb[11].mxu1 }
 0x145   :  { %924 = vst [vmem:[#allocation8 + $0x140] sm:$0xff] %v337_v11  ;;  %v500_v17 = vadd.f32 %v499_v16, %v1507_v29 }
 0x146   :  { %926 = vst [vmem:[#allocation8 + $0x150] sm:$0xff] %v498_v14  ;;  %925 = vst [vmem:[#allocation8 + $0x148] sm:$0xff] %v339_v15  ;;  %v342_v18 = vpop.f32.mrb[12].mxu0 }
 0x147   :  { %927 = vst [vmem:[#allocation8 + $0x158] sm:$0xff] %v500_v17  ;;  %v343_v19 = vadd.f32 %v342_v18, %v1498_v27  ;;  %v503_v20 = vpop.f32.mrb[12].mxu1  ;;  %v344_v21 = vpop.f32.mrb[13].mxu0 }
 0x148   :  { %v504_v23 = vadd.f32 %v503_v20, %v1501_v0  ;;  %v345_v46 = vadd.f32 %v344_v21, %v1504_v28  ;;  %v505_v9 = vpop.f32.mrb[13].mxu1 }
 0x149   :  { %932 = vst [vmem:[#allocation8 + $0x180] sm:$0xff] %v343_v19  ;;  %v506_v24 = vadd.f32 %v505_v9, %v1507_v29 }
 0x14a   :  { %934 = vst [vmem:[#allocation8 + $0x190] sm:$0xff] %v504_v23  ;;  %933 = vst [vmem:[#allocation8 + $0x188] sm:$0xff] %v345_v46  ;;  %v348_v25 = vpop.f32.mrb[14].mxu0 }
 0x14b   :  { %935 = vst [vmem:[#allocation8 + $0x198] sm:$0xff] %v506_v24  ;;  %v349_v26 = vadd.f32 %v348_v25, %v1498_v27  ;;  %v509_v30 = vpop.f32.mrb[14].mxu1  ;;  %v350_v31 = vpop.f32.mrb[15].mxu0 }
 0x14c   :  { %v510_v32 = vadd.f32 %v509_v30, %v1501_v0  ;;  %v351_v33 = vadd.f32 %v350_v31, %v1504_v28  ;;  %v511_v34 = vpop.f32.mrb[15].mxu1  ;;  %v218_v30 = vsub.s32 4, %v1489_v59 }
 0x14d   :  { %940 = vst [vmem:[#allocation8 + $0x1c0] sm:$0xff] %v349_v26  ;;  %v512_v35 = vadd.f32 %v511_v34, %v1507_v29  ;;  %v226_v34 = vsub.s32 6, %v1489_v59 }
 0x14e   :  { %942 = vst [vmem:[#allocation8 + $0x1d0] sm:$0xff] %v510_v32  ;;  %941 = vst [vmem:[#allocation8 + $0x1c8] sm:$0xff] %v351_v33  ;;  %v354_v36 = vpop.f32.mrb[16].mxu0 }
 0x14f   :  { %943 = vst [vmem:[#allocation8 + $0x1d8] sm:$0xff] %v512_v35  ;;  %v355_v37 = vadd.f32 %v354_v36, %v1498_v27  ;;  %v515_v38 = vpop.f32.mrb[16].mxu1  ;;  %v356_v39 = vpop.f32.mrb[17].mxu0  ;;  %v222_v35 = vsub.s32 5, %v1489_v59 }
 0x150   :  { %v516_v40 = vadd.f32 %v515_v38, %v1501_v0  ;;  %v357_v41 = vadd.f32 %v356_v39, %v1504_v28  ;;  %v517_v42 = vpop.f32.mrb[17].mxu1 }
 0x151   :  { %948 = vst [vmem:[#allocation8 + $0x200] sm:$0xff] %v355_v37  ;;  %v518_v43 = vadd.f32 %v517_v42, %v1507_v29  ;;  %v230_v37 = vsub.s32 7, %v1489_v59  ;;  %v1575_v42 = vrot.slane %v1492_v22, %v218_v30  ;;  %v1583_v59 = vrot.slane %v1492_v22, %v222_v35 }
 0x152   :  { %950 = vst [vmem:[#allocation8 + $0x210] sm:$0xff] %v516_v40  ;;  %949 = vst [vmem:[#allocation8 + $0x208] sm:$0xff] %v357_v41  ;;  %v360_v44 = vpop.f32.mrb[18].mxu0 }
 0x153   :  { %951 = vst [vmem:[#allocation8 + $0x218] sm:$0xff] %v518_v43  ;;  %v361_v45 = vadd.f32 %v360_v44, %v1498_v27  ;;  %v521_v47 = vpop.f32.mrb[18].mxu1  ;;  %v362_v48 = vpop.f32.mrb[19].mxu0 }
 0x154   :  { %v522_v49 = vadd.f32 %v521_v47, %v1501_v0  ;;  %v363_v50 = vadd.f32 %v362_v48, %v1504_v28  ;;  %v523_v51 = vpop.f32.mrb[19].mxu1  ;;  %v1580_v47 = vrot.slane %v1492_v22, %v226_v34 }
 0x155   :  { %956 = vst [vmem:[#allocation8 + $0x240] sm:$0xff] %v361_v45  ;;  %v524_v52 = vadd.f32 %v523_v51, %v1507_v29 }
 0x156   :  { %958 = vst [vmem:[#allocation8 + $0x250] sm:$0xff] %v522_v49  ;;  %957 = vst [vmem:[#allocation8 + $0x248] sm:$0xff] %v363_v50  ;;  %v366_v53 = vpop.f32.mrb[20].mxu0 }
 0x157   :  { %959 = vst [vmem:[#allocation8 + $0x258] sm:$0xff] %v524_v52  ;;  %v367_v54 = vadd.f32 %v366_v53, %v1498_v27  ;;  %v527_v55 = vpop.f32.mrb[20].mxu1  ;;  %v368_v56 = vpop.f32.mrb[21].mxu0 }
 0x158   :  { %v528_v57 = vadd.f32 %v527_v55, %v1501_v0  ;;  %v369_v58 = vadd.f32 %v368_v56, %v1504_v28  ;;  %v529_v60 = vpop.f32.mrb[21].mxu1 }
 0x159   :  { %964 = vst [vmem:[#allocation8 + $0x280] sm:$0xff] %v367_v54  ;;  %v530_v61 = vadd.f32 %v529_v60, %v1507_v29 }
 0x15a   :  { %966 = vst [vmem:[#allocation8 + $0x290] sm:$0xff] %v528_v57  ;;  %965 = vst [vmem:[#allocation8 + $0x288] sm:$0xff] %v369_v58  ;;  %v372_v62 = vpop.f32.mrb[22].mxu0 }
 0x15b   :  { %967 = vst [vmem:[#allocation8 + $0x298] sm:$0xff] %v530_v61  ;;  %v373_v63 = vadd.f32 %v372_v62, %v1498_v27  ;;  %v533_v1 = vpop.f32.mrb[22].mxu1  ;;  %v374_v2 = vpop.f32.mrb[23].mxu0 }
 0x15c   :  { %v534_v3 = vadd.f32 %v533_v1, %v1501_v0  ;;  %v375_v4 = vadd.f32 %v374_v2, %v1504_v28  ;;  %v535_v5 = vpop.f32.mrb[23].mxu1 }
 0x15d   :  { %972 = vst [vmem:[#allocation8 + $0x2c0] sm:$0xff] %v373_v63  ;;  %v536_v6 = vadd.f32 %v535_v5, %v1507_v29 }
 0x15e   :  { %974 = vst [vmem:[#allocation8 + $0x2d0] sm:$0xff] %v534_v3  ;;  %973 = vst [vmem:[#allocation8 + $0x2c8] sm:$0xff] %v375_v4  ;;  %v378_v7 = vpop.f32.mrb[24].mxu0 }
 0x15f   :  { %975 = vst [vmem:[#allocation8 + $0x2d8] sm:$0xff] %v536_v6  ;;  %v379_v8 = vadd.f32 %v378_v7, %v1498_v27  ;;  %v539_v10 = vpop.f32.mrb[24].mxu1  ;;  %v380_v11 = vpop.f32.mrb[25].mxu0 }
 0x160   :  { %v540_v12 = vadd.f32 %v539_v10, %v1501_v0  ;;  %v381_v13 = vadd.f32 %v380_v11, %v1504_v28  ;;  %v541_v14 = vpop.f32.mrb[25].mxu1 }
 0x161   :  { %980 = vst [vmem:[#allocation8 + $0x300] sm:$0xff] %v379_v8  ;;  %v542_v15 = vadd.f32 %v541_v14, %v1507_v29 }
 0x162   :  { %982 = vst [vmem:[#allocation8 + $0x310] sm:$0xff] %v540_v12  ;;  %981 = vst [vmem:[#allocation8 + $0x308] sm:$0xff] %v381_v13  ;;  %v384_v16 = vpop.f32.mrb[26].mxu0 }
 0x163   :  { %983 = vst [vmem:[#allocation8 + $0x318] sm:$0xff] %v542_v15  ;;  %v385_v17 = vadd.f32 %v384_v16, %v1498_v27  ;;  %v545_v18 = vpop.f32.mrb[26].mxu1  ;;  %v386_v19 = vpop.f32.mrb[27].mxu0 }
 0x164   :  { %v546_v20 = vadd.f32 %v545_v18, %v1501_v0  ;;  %v387_v21 = vadd.f32 %v386_v19, %v1504_v28  ;;  %v547_v23 = vpop.f32.mrb[27].mxu1 }
 0x165   :  { %988 = vst [vmem:[#allocation8 + $0x340] sm:$0xff] %v385_v17  ;;  %v548_v46 = vadd.f32 %v547_v23, %v1507_v29 }
 0x166   :  { %990 = vst [vmem:[#allocation8 + $0x350] sm:$0xff] %v546_v20  ;;  %989 = vst [vmem:[#allocation8 + $0x348] sm:$0xff] %v387_v21  ;;  %v390_v9 = vpop.f32.mrb[28].mxu0 }
 0x167   :  { %991 = vst [vmem:[#allocation8 + $0x358] sm:$0xff] %v548_v46  ;;  %v391_v24 = vadd.f32 %v390_v9, %v1498_v27  ;;  %v551_v25 = vpop.f32.mrb[28].mxu1  ;;  %v392_v26 = vpop.f32.mrb[29].mxu0 }
 0x168   :  { %v552_v31 = vadd.f32 %v551_v25, %v1501_v0  ;;  %v393_v32 = vadd.f32 %v392_v26, %v1504_v28  ;;  %v553_v33 = vpop.f32.mrb[29].mxu1 }
 0x169   :  { %996 = vst [vmem:[#allocation8 + $0x380] sm:$0xff] %v391_v24  ;;  %v554_v36 = vadd.f32 %v553_v33, %v1507_v29 }
 0x16a   :  { %998 = vst [vmem:[#allocation8 + $0x390] sm:$0xff] %v552_v31  ;;  %997 = vst [vmem:[#allocation8 + $0x388] sm:$0xff] %v393_v32  ;;  %v396_v38 = vpop.f32.mrb[30].mxu0 }
 0x16b   :  { %999 = vst [vmem:[#allocation8 + $0x398] sm:$0xff] %v554_v36  ;;  %v397_v39 = vadd.f32 %v396_v38, %v1498_v27  ;;  %v557_v40 = vpop.f32.mrb[30].mxu1  ;;  %v398_v41 = vpop.f32.mrb[31].mxu0  ;;  %v1587_v27 = vrot.slane %v1492_v22, %v230_v37 }
 0x16c   :  { %v558_v43 = vadd.f32 %v557_v40, %v1501_v0  ;;  %v399_v44 = vadd.f32 %v398_v41, %v1504_v28  ;;  %v559_v45 = vpop.f32.mrb[31].mxu1 }
 0x16d   :  { %1004 = vst [vmem:[#allocation8 + $0x3c0] sm:$0xff] %v397_v39  ;;  %v560_v48 = vadd.f32 %v559_v45, %v1507_v29 }
 0x16e   :  { %1006 = vst [vmem:[#allocation8 + $0x3d0] sm:$0xff] %v558_v43  ;;  %1005 = vst [vmem:[#allocation8 + $0x3c8] sm:$0xff] %v399_v44  ;;  %v628_v49 = vpop.f32.mrb[32].mxu0 }
 0x16f   :  { %1007 = vst [vmem:[#allocation8 + $0x3d8] sm:$0xff] %v560_v48  ;;  %v629_v0 = vadd.f32 %v628_v49, %v1575_v42  ;;  %v789_v28 = vpop.f32.mrb[32].mxu1  ;;  %v630_v50 = vpop.f32.mrb[33].mxu0 }
 0x170   :  { %v790_v51 = vadd.f32 %v789_v28, %v1580_v47  ;;  %v631_v52 = vadd.f32 %v630_v50, %v1583_v59  ;;  %v791_v53 = vpop.f32.mrb[33].mxu1 }
 0x171   :  { %888 = vst [vmem:[#allocation8 + $0x20] sm:$0xff] %v629_v0  ;;  %v792_v54 = vadd.f32 %v791_v53, %v1587_v27 }
 0x172   :  { %890 = vst [vmem:[#allocation8 + $0x30] sm:$0xff] %v790_v51  ;;  %889 = vst [vmem:[#allocation8 + $0x28] sm:$0xff] %v631_v52  ;;  %v634_v22 = vpop.f32.mrb[34].mxu0 }
 0x173   :  { %891 = vst [vmem:[#allocation8 + $0x38] sm:$0xff] %v792_v54  ;;  %v635_v29 = vadd.f32 %v634_v22, %v1575_v42  ;;  %v795_v55 = vpop.f32.mrb[34].mxu1  ;;  %v636_v56 = vpop.f32.mrb[35].mxu0 }
 0x174   :  { %v796_v57 = vadd.f32 %v795_v55, %v1580_v47  ;;  %v637_v58 = vadd.f32 %v636_v56, %v1583_v59  ;;  %v797_v60 = vpop.f32.mrb[35].mxu1 }
 0x175   :  { %896 = vst [vmem:[#allocation8 + $0x60] sm:$0xff] %v635_v29  ;;  %v798_v61 = vadd.f32 %v797_v60, %v1587_v27 }
 0x176   :  { %898 = vst [vmem:[#allocation8 + $0x70] sm:$0xff] %v796_v57  ;;  %897 = vst [vmem:[#allocation8 + $0x68] sm:$0xff] %v637_v58  ;;  %v640_v62 = vpop.f32.mrb[36].mxu0 }
 0x177   :  { %899 = vst [vmem:[#allocation8 + $0x78] sm:$0xff] %v798_v61  ;;  %v641_v63 = vadd.f32 %v640_v62, %v1575_v42  ;;  %v801_v1 = vpop.f32.mrb[36].mxu1  ;;  %v642_v2 = vpop.f32.mrb[37].mxu0 }
 0x178   :  { %v802_v3 = vadd.f32 %v801_v1, %v1580_v47  ;;  %v643_v4 = vadd.f32 %v642_v2, %v1583_v59  ;;  %v803_v5 = vpop.f32.mrb[37].mxu1 }
 0x179   :  { %904 = vst [vmem:[#allocation8 + $0xa0] sm:$0xff] %v641_v63  ;;  %v804_v6 = vadd.f32 %v803_v5, %v1587_v27 }
 0x17a   :  { %906 = vst [vmem:[#allocation8 + $0xb0] sm:$0xff] %v802_v3  ;;  %905 = vst [vmem:[#allocation8 + $0xa8] sm:$0xff] %v643_v4  ;;  %v646_v7 = vpop.f32.mrb[38].mxu0 }
 0x17b   :  { %907 = vst [vmem:[#allocation8 + $0xb8] sm:$0xff] %v804_v6  ;;  %v647_v8 = vadd.f32 %v646_v7, %v1575_v42  ;;  %v807_v10 = vpop.f32.mrb[38].mxu1  ;;  %v648_v11 = vpop.f32.mrb[39].mxu0 }
 0x17c   :  { %v808_v12 = vadd.f32 %v807_v10, %v1580_v47  ;;  %v649_v13 = vadd.f32 %v648_v11, %v1583_v59  ;;  %v809_v14 = vpop.f32.mrb[39].mxu1 }
 0x17d   :  { %912 = vst [vmem:[#allocation8 + $0xe0] sm:$0xff] %v647_v8  ;;  %v810_v15 = vadd.f32 %v809_v14, %v1587_v27 }
 0x17e   :  { %914 = vst [vmem:[#allocation8 + $0xf0] sm:$0xff] %v808_v12  ;;  %913 = vst [vmem:[#allocation8 + $0xe8] sm:$0xff] %v649_v13  ;;  %v652_v16 = vpop.f32.mrb[40].mxu0 }
 0x17f   :  { %915 = vst [vmem:[#allocation8 + $0xf8] sm:$0xff] %v810_v15  ;;  %v653_v17 = vadd.f32 %v652_v16, %v1575_v42  ;;  %v813_v18 = vpop.f32.mrb[40].mxu1  ;;  %v654_v19 = vpop.f32.mrb[41].mxu0 }
 0x180   :  { %v814_v20 = vadd.f32 %v813_v18, %v1580_v47  ;;  %v655_v21 = vadd.f32 %v654_v19, %v1583_v59  ;;  %v815_v23 = vpop.f32.mrb[41].mxu1 }
 0x181   :  { %920 = vst [vmem:[#allocation8 + $0x120] sm:$0xff] %v653_v17  ;;  %v816_v46 = vadd.f32 %v815_v23, %v1587_v27 }
 0x182   :  { %922 = vst [vmem:[#allocation8 + $0x130] sm:$0xff] %v814_v20  ;;  %921 = vst [vmem:[#allocation8 + $0x128] sm:$0xff] %v655_v21  ;;  %v658_v9 = vpop.f32.mrb[42].mxu0 }
 0x183   :  { %923 = vst [vmem:[#allocation8 + $0x138] sm:$0xff] %v816_v46  ;;  %v659_v24 = vadd.f32 %v658_v9, %v1575_v42  ;;  %v819_v25 = vpop.f32.mrb[42].mxu1  ;;  %v660_v26 = vpop.f32.mrb[43].mxu0 }
 0x184   :  { %v820_v30 = vadd.f32 %v819_v25, %v1580_v47  ;;  %v661_v31 = vadd.f32 %v660_v26, %v1583_v59  ;;  %v821_v32 = vpop.f32.mrb[43].mxu1 }
 0x185   :  { %928 = vst [vmem:[#allocation8 + $0x160] sm:$0xff] %v659_v24  ;;  %v822_v33 = vadd.f32 %v821_v32, %v1587_v27 }
 0x186   :  { %930 = vst [vmem:[#allocation8 + $0x170] sm:$0xff] %v820_v30  ;;  %929 = vst [vmem:[#allocation8 + $0x168] sm:$0xff] %v661_v31  ;;  %v664_v34 = vpop.f32.mrb[44].mxu0 }
 0x187   :  { %931 = vst [vmem:[#allocation8 + $0x178] sm:$0xff] %v822_v33  ;;  %v665_v35 = vadd.f32 %v664_v34, %v1575_v42  ;;  %v825_v36 = vpop.f32.mrb[44].mxu1  ;;  %v666_v37 = vpop.f32.mrb[45].mxu0 }
 0x188   :  { %v826_v38 = vadd.f32 %v825_v36, %v1580_v47  ;;  %v667_v39 = vadd.f32 %v666_v37, %v1583_v59  ;;  %v827_v40 = vpop.f32.mrb[45].mxu1 }
 0x189   :  { %936 = vst [vmem:[#allocation8 + $0x1a0] sm:$0xff] %v665_v35  ;;  %v828_v41 = vadd.f32 %v827_v40, %v1587_v27 }
 0x18a   :  { %938 = vst [vmem:[#allocation8 + $0x1b0] sm:$0xff] %v826_v38  ;;  %937 = vst [vmem:[#allocation8 + $0x1a8] sm:$0xff] %v667_v39  ;;  %v670_v43 = vpop.f32.mrb[46].mxu0 }
 0x18b   :  { %939 = vst [vmem:[#allocation8 + $0x1b8] sm:$0xff] %v828_v41  ;;  %v671_v44 = vadd.f32 %v670_v43, %v1575_v42  ;;  %v831_v45 = vpop.f32.mrb[46].mxu1  ;;  %v672_v48 = vpop.f32.mrb[47].mxu0 }
 0x18c   :  { %v832_v49 = vadd.f32 %v831_v45, %v1580_v47  ;;  %v673_v0 = vadd.f32 %v672_v48, %v1583_v59  ;;  %v833_v28 = vpop.f32.mrb[47].mxu1 }
 0x18d   :  { %944 = vst [vmem:[#allocation8 + $0x1e0] sm:$0xff] %v671_v44  ;;  %v834_v50 = vadd.f32 %v833_v28, %v1587_v27 }
 0x18e   :  { %946 = vst [vmem:[#allocation8 + $0x1f0] sm:$0xff] %v832_v49  ;;  %945 = vst [vmem:[#allocation8 + $0x1e8] sm:$0xff] %v673_v0  ;;  %v676_v51 = vpop.f32.mrb[48].mxu0 }
 0x18f   :  { %947 = vst [vmem:[#allocation8 + $0x1f8] sm:$0xff] %v834_v50  ;;  %v677_v52 = vadd.f32 %v676_v51, %v1575_v42  ;;  %v837_v53 = vpop.f32.mrb[48].mxu1  ;;  %v678_v54 = vpop.f32.mrb[49].mxu0 }
 0x190   :  { %v838_v22 = vadd.f32 %v837_v53, %v1580_v47  ;;  %v679_v29 = vadd.f32 %v678_v54, %v1583_v59  ;;  %v839_v55 = vpop.f32.mrb[49].mxu1 }
 0x191   :  { %952 = vst [vmem:[#allocation8 + $0x220] sm:$0xff] %v677_v52  ;;  %v840_v56 = vadd.f32 %v839_v55, %v1587_v27 }
 0x192   :  { %954 = vst [vmem:[#allocation8 + $0x230] sm:$0xff] %v838_v22  ;;  %953 = vst [vmem:[#allocation8 + $0x228] sm:$0xff] %v679_v29  ;;  %v682_v57 = vpop.f32.mrb[50].mxu0 }
 0x193   :  { %955 = vst [vmem:[#allocation8 + $0x238] sm:$0xff] %v840_v56  ;;  %v683_v58 = vadd.f32 %v682_v57, %v1575_v42  ;;  %v843_v60 = vpop.f32.mrb[50].mxu1  ;;  %v684_v61 = vpop.f32.mrb[51].mxu0 }
 0x194   :  { %v844_v62 = vadd.f32 %v843_v60, %v1580_v47  ;;  %v685_v63 = vadd.f32 %v684_v61, %v1583_v59  ;;  %v845_v1 = vpop.f32.mrb[51].mxu1 }
 0x195   :  { %960 = vst [vmem:[#allocation8 + $0x260] sm:$0xff] %v683_v58  ;;  %v846_v2 = vadd.f32 %v845_v1, %v1587_v27 }
 0x196   :  { %962 = vst [vmem:[#allocation8 + $0x270] sm:$0xff] %v844_v62  ;;  %961 = vst [vmem:[#allocation8 + $0x268] sm:$0xff] %v685_v63  ;;  %v688_v3 = vpop.f32.mrb[52].mxu0 }
 0x197   :  { %963 = vst [vmem:[#allocation8 + $0x278] sm:$0xff] %v846_v2  ;;  %v689_v4 = vadd.f32 %v688_v3, %v1575_v42  ;;  %v849_v5 = vpop.f32.mrb[52].mxu1  ;;  %v690_v6 = vpop.f32.mrb[53].mxu0 }
 0x198   :  { %v850_v7 = vadd.f32 %v849_v5, %v1580_v47  ;;  %v691_v8 = vadd.f32 %v690_v6, %v1583_v59  ;;  %v851_v10 = vpop.f32.mrb[53].mxu1 }
 0x199   :  { %968 = vst [vmem:[#allocation8 + $0x2a0] sm:$0xff] %v689_v4  ;;  %v852_v11 = vadd.f32 %v851_v10, %v1587_v27 }
 0x19a   :  { %970 = vst [vmem:[#allocation8 + $0x2b0] sm:$0xff] %v850_v7  ;;  %969 = vst [vmem:[#allocation8 + $0x2a8] sm:$0xff] %v691_v8  ;;  %v694_v12 = vpop.f32.mrb[54].mxu0 }
 0x19b   :  { %971 = vst [vmem:[#allocation8 + $0x2b8] sm:$0xff] %v852_v11  ;;  %v695_v13 = vadd.f32 %v694_v12, %v1575_v42  ;;  %v855_v14 = vpop.f32.mrb[54].mxu1  ;;  %v696_v15 = vpop.f32.mrb[55].mxu0 }
 0x19c   :  { %v856_v16 = vadd.f32 %v855_v14, %v1580_v47  ;;  %v697_v17 = vadd.f32 %v696_v15, %v1583_v59  ;;  %v857_v18 = vpop.f32.mrb[55].mxu1 }
 0x19d   :  { %976 = vst [vmem:[#allocation8 + $0x2e0] sm:$0xff] %v695_v13  ;;  %v858_v19 = vadd.f32 %v857_v18, %v1587_v27 }
 0x19e   :  { %978 = vst [vmem:[#allocation8 + $0x2f0] sm:$0xff] %v856_v16  ;;  %977 = vst [vmem:[#allocation8 + $0x2e8] sm:$0xff] %v697_v17  ;;  %v700_v20 = vpop.f32.mrb[56].mxu0 }
 0x19f   :  { %979 = vst [vmem:[#allocation8 + $0x2f8] sm:$0xff] %v858_v19  ;;  %v701_v21 = vadd.f32 %v700_v20, %v1575_v42  ;;  %v861_v23 = vpop.f32.mrb[56].mxu1  ;;  %v702_v46 = vpop.f32.mrb[57].mxu0 }
 0x1a0   :  { %v862_v9 = vadd.f32 %v861_v23, %v1580_v47  ;;  %v703_v24 = vadd.f32 %v702_v46, %v1583_v59  ;;  %v863_v25 = vpop.f32.mrb[57].mxu1 }
 0x1a1   :  { %984 = vst [vmem:[#allocation8 + $0x320] sm:$0xff] %v701_v21  ;;  %v864_v26 = vadd.f32 %v863_v25, %v1587_v27 }
 0x1a2   :  { %986 = vst [vmem:[#allocation8 + $0x330] sm:$0xff] %v862_v9  ;;  %985 = vst [vmem:[#allocation8 + $0x328] sm:$0xff] %v703_v24  ;;  %v706_v30 = vpop.f32.mrb[58].mxu0 }
 0x1a3   :  { %987 = vst [vmem:[#allocation8 + $0x338] sm:$0xff] %v864_v26  ;;  %v707_v31 = vadd.f32 %v706_v30, %v1575_v42  ;;  %v867_v32 = vpop.f32.mrb[58].mxu1  ;;  %v708_v33 = vpop.f32.mrb[59].mxu0 }
 0x1a4   :  { %v868_v34 = vadd.f32 %v867_v32, %v1580_v47  ;;  %v709_v35 = vadd.f32 %v708_v33, %v1583_v59  ;;  %v869_v36 = vpop.f32.mrb[59].mxu1 }
 0x1a5   :  { %992 = vst [vmem:[#allocation8 + $0x360] sm:$0xff] %v707_v31  ;;  %v870_v37 = vadd.f32 %v869_v36, %v1587_v27 }
 0x1a6   :  { %994 = vst [vmem:[#allocation8 + $0x370] sm:$0xff] %v868_v34  ;;  %993 = vst [vmem:[#allocation8 + $0x368] sm:$0xff] %v709_v35  ;;  %v712_v38 = vpop.f32.mrb[60].mxu0 }
 0x1a7   :  { %995 = vst [vmem:[#allocation8 + $0x378] sm:$0xff] %v870_v37  ;;  %v713_v39 = vadd.f32 %v712_v38, %v1575_v42  ;;  %v873_v40 = vpop.f32.mrb[60].mxu1  ;;  %v714_v41 = vpop.f32.mrb[61].mxu0 }
 0x1a8   :  { %v874_v43 = vadd.f32 %v873_v40, %v1580_v47  ;;  %v715_v44 = vadd.f32 %v714_v41, %v1583_v59  ;;  %v875_v45 = vpop.f32.mrb[61].mxu1 }
 0x1a9   :  { %1000 = vst [vmem:[#allocation8 + $0x3a0] sm:$0xff] %v713_v39  ;;  %v876_v48 = vadd.f32 %v875_v45, %v1587_v27 }
 0x1aa   :  { %1002 = vst [vmem:[#allocation8 + $0x3b0] sm:$0xff] %v874_v43  ;;  %1001 = vst [vmem:[#allocation8 + $0x3a8] sm:$0xff] %v715_v44  ;;  %v718_v49 = vpop.f32.mrb[62].mxu0 }
 0x1ab   :  { %1003 = vst [vmem:[#allocation8 + $0x3b8] sm:$0xff] %v876_v48  ;;  %v719_v0 = vadd.f32 %v718_v49, %v1575_v42  ;;  %v879_v28 = vpop.f32.mrb[62].mxu1  ;;  %v720_v50 = vpop.f32.mrb[63].mxu0 }
 0x1ac   :  { %v880_v51 = vadd.f32 %v879_v28, %v1580_v47  ;;  %v721_v52 = vadd.f32 %v720_v50, %v1583_v59  ;;  %v881_v53 = vpop.f32.mrb[63].mxu1 }
 0x1ad   :  { %1008 = vst [vmem:[#allocation8 + $0x3e0] sm:$0xff] %v719_v0  ;;  %v882_v54 = vadd.f32 %v881_v53, %v1587_v27 }
 0x1ae   :  { %1010 = vst [vmem:[#allocation8 + $0x3f0] sm:$0xff] %v880_v51  ;;  %1009 = vst [vmem:[#allocation8 + $0x3e8] sm:$0xff] %v721_v52 }
 0x1af   :  { %1011 = vst [vmem:[#allocation8 + $0x3f8] sm:$0xff] %v882_v54 }
 0x1b0   :  { %1244 = shalt.err (!%p1241_p0)
}
 0x1b1   :  { %s1245_s29 = scalar_lea.hbm %s1671_s3, 16384 }
 0x1b2   :  { %p1246_p1 = scmp.ne.s32.totalorder %s1671_s3, %s1245_s29  ;;  %p1249_p2 = scmp.lt.u32.totalorder %s1245_s29, %s1671_s3 }
 0x1b4   :  { %p1251_p3 = pnand %p1249_p2, %p1246_p1 }
 0x1b6   :  { %1254 = shalt.err (!%p1251_p3)
}
 0x1b7   :  { %1023 = dma.vmem_to_hbm [thread:$0]  %s1018_s25, 16384, %s1671_s3, [#allocation4], %s1262_s22, %s1262_s22, %s1263_s23  }
 0x1b8   :  { %1259 = dma.done.wait [#allocation4], 16384  }
 0x1b9   :  { %1260 = vsyncadd [#allocation4], 4294950912 }
 0x1ba   :  { %1027 = vsyncpa [#allocation3], 1 }
 0x1bb   :  { %1028 = vsyncpa [#allocation6], 1 }
 0x1bc   :  { %1029 = vsyncpa [#allocation4], 1 }

</bundles_post_ra>
